<compile_context>
chip_gen: v7x
topology: tpu7x:2x2x1
jax: 0.10.0
libtpu: 0.0.40
codegen_flags: <defaults>
</compile_context>

<pallas_src>
import functools

import numpy as np
import jax
import jax.numpy as jnp
from jax.experimental import pallas as pl
from jax.experimental.pallas import tpu as pltpu

LANE_PAD = 128                 # lane-dense width of the final output store
OC1, OC2, OC3 = 32, 64, 32     # conv output channels (fixed by the module)
NOFF2 = 16                     # conv2 kernel offsets (4*4)


def conv_out(d, k, s):
    return (d - k) // s + 1


def _round_up(x, m):
    return ((x + m - 1) // m) * m


def cnn_dims(H, W, C):
    """Static geometry + packed-buffer layout for the fixed 8/4/3 conv stack."""
    h1, w1 = conv_out(H, 8, 4), conv_out(W, 8, 4)
    h2, w2 = conv_out(h1, 4, 2), conv_out(w1, 4, 2)
    h3, w3 = conv_out(h2, 3, 1), conv_out(w2, 3, 1)
    n1, n2 = h1 * w1, h2 * w2
    d = {
        "C": C, "h1": h1, "w1": w1, "h2": h2, "w2": w2, "h3": h3, "w3": w3,
        "n1": n1, "n1p": _round_up(n1, 8),   # conv1 output rows / image (padded)
        "n2": n2, "n2p": _round_up(n2, 8),   # conv2 output rows / image (padded)
        "k1": 8 * 8 * C,                     # conv1 im2col width
        "k2": 4 * 4 * OC1,                   # conv2 im2col width (512)
        "fc_in": OC3 * h3 * w3,              # FC input features
    }
    d["k3p"] = d["n2p"] * OC2                # padded conv3 im2col width (1024)
    d["b1_row"] = d["k1"] + d["k3p"]         # row of b1 inside pack32
    return d


# ---------------------------------------------------------------------------
# Fused Pallas kernel — one grid step per image (batch axis is "parallel")
# ---------------------------------------------------------------------------
def _fused_cnn_kernel(cols1_ref, s2_ref, p32_ref, p64_ref, p128_ref,
                      out_ref, cols2_scr, y2f_scr, *, d):
    f32 = jnp.float32
    k1, k2, k3p = d["k1"], d["k2"], d["k3p"]
    n2p, fc_in = d["n2p"], d["fc_in"]

    # ---- conv1: relu(cols1 @ W1 + b1) ------------------------------ (n1p, 32)
    w1 = p32_ref[0:k1, :]
    b1 = p32_ref[d["b1_row"]:d["b1_row"] + 1, :]
    y1 = jnp.maximum(
        jnp.dot(cols1_ref[0], w1, preferred_element_type=f32) + b1, 0.0)

    # ---- conv2: one gather matmul + relayout + one K=512 matmul ---- (n2p, 64)
    # gather rows are ordered k-major (row = k*n2p + p)
    g = jnp.dot(s2_ref[...], y1, preferred_element_type=f32)     # (16*n2p, 32)
    # relayout (16*n2p, 32) -> (n2p, 16*32) through VMEM scratch
    # (static row/lane slices only — cheap, off the MXU path)
    for k in range(NOFF2):
        cols2_scr[:, k * OC1:(k + 1) * OC1] = g[k * n2p:(k + 1) * n2p, :]
    w2 = p64_ref[0:k2, :]
    b2 = p64_ref[k2:k2 + 1, :]
    y2 = jnp.maximum(
        jnp.dot(cols2_scr[...], w2, preferred_element_type=f32) + b2, 0.0)

    # ---- conv3 (1x1 output, NO ReLU): single K=n2p*64 matmul -------- (1, 32)
    # flatten (n2p, 64) -> (1, n2p*64); padded rows hit zero rows of W3.
    for p in range(n2p):
        y2f_scr[:, p * OC2:(p + 1) * OC2] = y2[p:p + 1, :]
    w3 = p32_ref[k1:k1 + k3p, :]
    y3 = jnp.dot(y2f_scr[...], w3, preferred_element_type=f32)

    # ---- FC + ReLU (conv3 bias pre-folded into bf) ------------------ (1, 128)
    wf = p128_ref[0:fc_in, :]
    bf = p128_ref[fc_in:fc_in + 1, :]
    out_ref[0] = jnp.maximum(
        jnp.dot(y3, wf, preferred_element_type=f32) + bf, 0.0)


def _const_spec(a):
    nd = a.ndim
    return pl.BlockSpec(a.shape, lambda b: (0,) * nd)     # resident constant


def _fused_cnn(cols1, kp, d):
    B = cols1.shape[0]
    kernel = functools.partial(_fused_cnn_kernel, d=d)
    out_shape = jax.ShapeDtypeStruct((B, 1, LANE_PAD), jnp.float32)
    return pl.pallas_call(
        kernel,
        out_shape=out_shape,
        grid=(B,),
        in_specs=[
            pl.BlockSpec((1, d["n1p"], d["k1"]), lambda b: (b, 0, 0)),  # cols1
            _const_spec(kp["s2"]),
            _const_spec(kp["p32"]),
            _const_spec(kp["p64"]),
            _const_spec(kp["p128"]),
        ],
        out_specs=pl.BlockSpec((1, 1, LANE_PAD), lambda b: (b, 0, 0)),
        scratch_shapes=[
            pltpu.VMEM((d["n2p"], d["k2"]), jnp.float32),   # cols2 relayout
            pltpu.VMEM((1, d["k3p"]), jnp.float32),         # conv3 flatten
        ],
        compiler_params=pltpu.CompilerParams(
            dimension_semantics=("parallel",)),             # v7x: image/core
    )(cols1, kp["s2"], kp["p32"], kp["p64"], kp["p128"])


# ---------------------------------------------------------------------------
# conv1 im2col (tiny XLA rearrangement fused into the same jit)
# column order = (kh, kw, C) matching the weight layout below
# ---------------------------------------------------------------------------
def _im2col_conv1(x, d):
    B, H, W, C = x.shape
    h1, w1 = d["h1"], d["w1"]
    pieces = []
    for i in range(8):
        for j in range(8):
            patch = x[:, i:i + 4 * h1:4, j:j + 4 * w1:4, :]   # (B, h1, w1, C)
            pieces.append(patch.reshape(B, h1 * w1, C))
    cols = jnp.concatenate(pieces, axis=-1)                   # (B, n1, 64*C)
    pad = d["n1p"] - d["n1"]
    if pad:
        cols = jnp.pad(cols, ((0, 0), (0, pad), (0, 0)))
    return cols


# ---------------------------------------------------------------------------
# One-time, batch-independent parameter preparation
# ---------------------------------------------------------------------------
def _build_selection(d):
    """Per-image one-hot gather for conv2 (k-major rows): S[k*n2p+p, src]=1."""
    n1p, n2p = d["n1p"], d["n2p"]
    w1, h2, w2 = d["w1"], d["h2"], d["w2"]
    S = np.zeros((NOFF2 * n2p, n1p), np.float32)
    for i in range(4):
        for j in range(4):
            k = i * 4 + j
            for pr in range(h2):
                for pc in range(w2):
                    p = pr * w2 + pc
                    src = (2 * pr + i) * w1 + (2 * pc + j)
                    S[k * n2p + p, src] = 1.0
    return S


def _pack_rows(parts, width):
    total = sum(int(p.shape[0]) for p in parts)
    buf = np.zeros((_round_up(total, 8), width), np.float32)
    off = 0
    for p in parts:
        buf[off:off + p.shape[0], :p.shape[1]] = np.asarray(p, np.float32)
        off += p.shape[0]
    return jnp.asarray(buf)


def prepare_kernel_params(params, H, W):
    C = params["w1"].shape[1]
    d = cnn_dims(H, W, C)
    # TODO(synk): for final spatial > 1x1, fold the NCHW-flatten permutation
    # into wf's rows; the 1x1 case used here makes it the identity.
    assert d["h3"] == 1 and d["w3"] == 1, "kernel supports a 1x1 final map only"

    def conv_w_matrix(w_pt):               # (OC,IC,kh,kw) -> (kh*kw*IC, OC)
        w = np.asarray(w_pt, np.float32)
        OC, IC, kh, kw = w.shape
        return np.transpose(w, (2, 3, 1, 0)).reshape(kh * kw * IC, OC)

    w1m = conv_w_matrix(params["w1"])                        # (k1, 32)
    w2m = conv_w_matrix(params["w2"])                        # (512, 64)
    w3m = conv_w_matrix(params["w3"])                        # (576, 32)
    w3p = np.zeros((d["k3p"], OC3), np.float32)              # zero-padded rows
    w3p[:d["n2"] * OC2, :] = w3m

    out_size, fc_in = params["wf"].shape
    assert fc_in == d["fc_in"] and out_size <= LANE_PAD
    wf = np.zeros((fc_in, LANE_PAD), np.float32)
    wf[:, :out_size] = np.asarray(params["wf"], np.float32).T
    bf = np.zeros((1, LANE_PAD), np.float32)
    bf[:, :out_size] = np.asarray(params["bf"], np.float32)
    # fold conv3's bias through the (linear) FC: relu((y3 + b3) Wf + bf)
    b3 = np.asarray(params["b3"], np.float32).reshape(1, -1)
    bf_eff = b3 @ wf + bf

    b1 = np.asarray(params["b1"], np.float32).reshape(1, -1)
    b2 = np.asarray(params["b2"], np.float32).reshape(1, -1)

    kp = {
        "s2":   jnp.asarray(_build_selection(d)),            # (16*n2p, n1p)
        "p32":  _pack_rows([w1m, w3p, b1], OC1),              # W1 | W3 | b1
        "p64":  _pack_rows([w2m, b2], OC2),                   # W2 | b2
        "p128": _pack_rows([wf, bf_eff], LANE_PAD),           # WF | bf(+b3)
    }
    return kp, d


# ---------------------------------------------------------------------------
# Forward: one XLA im2col prep + one fused Pallas launch
# ---------------------------------------------------------------------------
def make_simple_cnn_forward(d, output_size):
    @jax.jit
    def fwd(kparams, rgb, depth):
        rgb = rgb.astype(jnp.float32) * (1.0 / 255.0)
        depth = depth.astype(jnp.float32)
        x = jnp.concatenate([rgb, depth], axis=-1)            # rgb then depth
        cols1 = _im2col_conv1(x, d)                           # (B, n1p, k1)
        out = _fused_cnn(cols1, kparams, d)                   # (B, 1, 128)
        return out[:, 0, :output_size]
    return fwd


# ---------------------------------------------------------------------------
# Init + pure-JAX reference (for correctness verification)
# ---------------------------------------------------------------------------
def kaiming_normal(key, shape, fan_in):
    return jnp.sqrt(2.0 / fan_in) * jax.random.normal(key, shape, jnp.float32)


def init_params(key, n_input, output_size, H, W):
    d = cnn_dims(H, W, n_input)
    final_feat = OC3 * d["h3"] * d["w3"]
    k1, k2, k3, k4 = jax.random.split(key, 4)
    return {
        "w1": kaiming_normal(k1, (OC1, n_input, 8, 8), n_input * 8 * 8),
        "b1": jnp.zeros((OC1,), jnp.float32),
        "w2": kaiming_normal(k2, (OC2, OC1, 4, 4), OC1 * 4 * 4),
        "b2": jnp.zeros((OC2,), jnp.float32),
        "w3": kaiming_normal(k3, (OC3, OC2, 3, 3), OC2 * 3 * 3),
        "b3": jnp.zeros((OC3,), jnp.float32),
        "wf": kaiming_normal(k4, (output_size, final_feat), final_feat),
        "bf": jnp.zeros((output_size,), jnp.float32),
    }


def reference_forward(params, rgb, depth):
    x = jnp.concatenate(
        [rgb.astype(jnp.float32) / 255.0, depth.astype(jnp.float32)], axis=-1)

    def conv(x, w_pt, b, stride):
        w = jnp.transpose(w_pt, (2, 3, 1, 0))                 # HWIO
        y = jax.lax.conv_general_dilated(
            x, w, window_strides=stride, padding="VALID",
            dimension_numbers=("NHWC", "HWIO", "NHWC"),
            precision=jax.lax.Precision.HIGHEST)
        return y + b.reshape(1, 1, 1, -1)

    y = jax.nn.relu(conv(x, params["w1"], params["b1"], (4, 4)))
    y = jax.nn.relu(conv(y, params["w2"], params["b2"], (2, 2)))
    y = conv(y, params["w3"], params["b3"], (1, 1))           # no ReLU here
    B = y.shape[0]
    y = jnp.transpose(y, (0, 3, 1, 2)).reshape(B, -1)         # NCHW flatten
    y = jnp.dot(y, params["wf"].T,
                precision=jax.lax.Precision.HIGHEST) + params["bf"]
    return jax.nn.relu(y)


if __name__ == "__main__":
    # 40x40 -> conv1(8x8,s4): 9x9 -> conv2(4x4,s2): 3x3 -> conv3(3x3,s1): 1x1
    B, H, W = 2, 40, 40
    N_RGB, N_DEPTH = 3, 1
    OUTPUT_SIZE = 32

    key = jax.random.PRNGKey(0)
    k_rgb, k_depth, k_param = jax.random.split(key, 3)
    rgb = jax.random.uniform(k_rgb, (B, H, W, N_RGB), jnp.float32, 0.0, 255.0)
    depth = jax.random.uniform(k_depth, (B, H, W, N_DEPTH), jnp.float32, 0.0, 1.0)

    params = init_params(k_param, n_input=N_RGB + N_DEPTH,
                         output_size=OUTPUT_SIZE, H=H, W=W)
    kparams, dims = prepare_kernel_params(params, H=H, W=W)
    fwd = make_simple_cnn_forward(dims, OUTPUT_SIZE)

    out = jax.block_until_ready(fwd(kparams, rgb, depth))
    assert out.shape == (B, OUTPUT_SIZE), out.shape

    ref = jax.block_until_ready(reference_forward(params, rgb, depth))
    max_err = float(jnp.max(jnp.abs(out - ref)))
    assert max_err < 5e-3, f"kernel/reference mismatch: max|diff|={max_err}"

    print("KERNEL_OK")
</pallas_src>

<mosaic_0001>
module attributes {stable_mosaic.version = 11 : i64} {
  func.func @_fused_cnn_kernel(%arg0: i32, %arg1: memref<1x88x256xf32, #tpu.memory_space<vmem>>, %arg2: memref<256x88xf32, #tpu.memory_space<vmem>>, %arg3: memref<1288x32xf32, #tpu.memory_space<vmem>>, %arg4: memref<520x64xf32, #tpu.memory_space<vmem>>, %arg5: memref<40x128xf32, #tpu.memory_space<vmem>>, %arg6: memref<1x1x128xf32, #tpu.memory_space<vmem>>, %arg7: memref<16x512xf32, #tpu.memory_space<vmem>>, %arg8: memref<1x1024xf32, #tpu.memory_space<vmem>>) attributes {dimension_semantics = [#tpu.dimension_semantics<parallel>], iteration_bounds = array<i64: 2>, scalar_prefetch = 0 : i64, scratch_operands = 2 : i64, tpu.core_type = #tpu.core_type<tc>, window_params = [{transform_indices = @transform_0, window_bounds = array<i64: 1, 88, 256>}, {pipeline_mode = #tpu.pipeline_mode<synchronous>, transform_indices = @transform_1, window_bounds = array<i64: 256, 88>}, {pipeline_mode = #tpu.pipeline_mode<synchronous>, transform_indices = @transform_2, window_bounds = array<i64: 1288, 32>}, {pipeline_mode = #tpu.pipeline_mode<synchronous>, transform_indices = @transform_3, window_bounds = array<i64: 520, 64>}, {pipeline_mode = #tpu.pipeline_mode<synchronous>, transform_indices = @transform_4, window_bounds = array<i64: 40, 128>}, {transform_indices = @transform_5, window_bounds = array<i64: 1, 1, 128>}]} {
    %c0 = arith.constant 0 : index
    %c0_0 = arith.constant 0 : index
    %0 = vector.load %arg3[%c0, %c0_0] : memref<1288x32xf32, #tpu.memory_space<vmem>>, vector<256x32xf32>
    %c1280 = arith.constant 1280 : index
    %c0_1 = arith.constant 0 : index
    %1 = vector.load %arg3[%c1280, %c0_1] : memref<1288x32xf32, #tpu.memory_space<vmem>>, vector<1x32xf32>
    %c0_2 = arith.constant 0 : index
    %c0_3 = arith.constant 0 : index
    %c0_4 = arith.constant 0 : index
    %2 = vector.load %arg1[%c0_2, %c0_3, %c0_4] : memref<1x88x256xf32, #tpu.memory_space<vmem>>, vector<1x88x256xf32>
    %3 = vector.shape_cast %2 : vector<1x88x256xf32> to vector<88x256xf32>
    %cst = arith.constant dense<0.000000e+00> : vector<88x32xf32>
    %4 = tpu.matmul %3, %0, %cst {dimension_numbers = #tpu.dot_dimension_numbers<[1], [0], [0], [1], [0, 0, 1, 1], [], []>} : vector<88x256xf32>, vector<256x32xf32>, vector<88x32xf32> -> vector<88x32xf32>
    %5 = vector.broadcast %1 : vector<1x32xf32> to vector<88x32xf32>
    %6 = arith.addf %4, %5 : vector<88x32xf32>
    %cst_5 = arith.constant 0.000000e+00 : f32
    %7 = vector.broadcast %cst_5 : f32 to vector<88x32xf32>
    %8 = arith.maximumf %6, %7 : vector<88x32xf32>
    %c0_6 = arith.constant 0 : index
    %c0_7 = arith.constant 0 : index
    %9 = vector.load %arg2[%c0_6, %c0_7] : memref<256x88xf32, #tpu.memory_space<vmem>>, vector<256x88xf32>
    %cst_8 = arith.constant dense<0.000000e+00> : vector<256x32xf32>
    %10 = tpu.matmul %9, %8, %cst_8 {dimension_numbers = #tpu.dot_dimension_numbers<[1], [0], [0], [1], [0, 0, 1, 1], [], []>} : vector<256x88xf32>, vector<88x32xf32>, vector<256x32xf32> -> vector<256x32xf32>
    %11 = vector.extract_strided_slice %10 {offsets = [0, 0], sizes = [16, 32], strides = [1, 1]} : vector<256x32xf32> to vector<16x32xf32>
    %c0_9 = arith.constant 0 : index
    %c0_10 = arith.constant 0 : index
    %12 = vector.load %arg7[%c0_9, %c0_10] : memref<16x512xf32, #tpu.memory_space<vmem>>, vector<16x32xf32>
    tpu.vector_store %arg7[%c0_9, %c0_10], %11 {strides = array<i32>} : memref<16x512xf32, #tpu.memory_space<vmem>>, vector<16x32xf32>,
    %13 = vector.extract_strided_slice %10 {offsets = [16, 0], sizes = [16, 32], strides = [1, 1]} : vector<256x32xf32> to vector<16x32xf32>
    %c0_11 = arith.constant 0 : index
    %c32 = arith.constant 32 : index
    %14 = vector.load %arg7[%c0_11, %c32] : memref<16x512xf32, #tpu.memory_space<vmem>>, vector<16x32xf32>
    tpu.vector_store %arg7[%c0_11, %c32], %13 {strides = array<i32>} : memref<16x512xf32, #tpu.memory_space<vmem>>, vector<16x32xf32>,
    %15 = vector.extract_strided_slice %10 {offsets = [32, 0], sizes = [16, 32], strides = [1, 1]} : vector<256x32xf32> to vector<16x32xf32>
    %c0_12 = arith.constant 0 : index
    %c64 = arith.constant 64 : index
    %16 = vector.load %arg7[%c0_12, %c64] : memref<16x512xf32, #tpu.memory_space<vmem>>, vector<16x32xf32>
    tpu.vector_store %arg7[%c0_12, %c64], %15 {strides = array<i32>} : memref<16x512xf32, #tpu.memory_space<vmem>>, vector<16x32xf32>,
    %17 = vector.extract_strided_slice %10 {offsets = [48, 0], sizes = [16, 32], strides = [1, 1]} : vector<256x32xf32> to vector<16x32xf32>
    %c0_13 = arith.constant 0 : index
    %c96 = arith.constant 96 : index
    %18 = vector.load %arg7[%c0_13, %c96] : memref<16x512xf32, #tpu.memory_space<vmem>>, vector<16x32xf32>
    tpu.vector_store %arg7[%c0_13, %c96], %17 {strides = array<i32>} : memref<16x512xf32, #tpu.memory_space<vmem>>, vector<16x32xf32>,
    %19 = vector.extract_strided_slice %10 {offsets = [64, 0], sizes = [16, 32], strides = [1, 1]} : vector<256x32xf32> to vector<16x32xf32>
    %c0_14 = arith.constant 0 : index
    %c128 = arith.constant 128 : index
    %20 = vector.load %arg7[%c0_14, %c128] : memref<16x512xf32, #tpu.memory_space<vmem>>, vector<16x32xf32>
    tpu.vector_store %arg7[%c0_14, %c128], %19 {strides = array<i32>} : memref<16x512xf32, #tpu.memory_space<vmem>>, vector<16x32xf32>,
    %21 = vector.extract_strided_slice %10 {offsets = [80, 0], sizes = [16, 32], strides = [1, 1]} : vector<256x32xf32> to vector<16x32xf32>
    %c0_15 = arith.constant 0 : index
    %c160 = arith.constant 160 : index
    %22 = vector.load %arg7[%c0_15, %c160] : memref<16x512xf32, #tpu.memory_space<vmem>>, vector<16x32xf32>
    tpu.vector_store %arg7[%c0_15, %c160], %21 {strides = array<i32>} : memref<16x512xf32, #tpu.memory_space<vmem>>, vector<16x32xf32>,
    %23 = vector.extract_strided_slice %10 {offsets = [96, 0], sizes = [16, 32], strides = [1, 1]} : vector<256x32xf32> to vector<16x32xf32>
    %c0_16 = arith.constant 0 : index
    %c192 = arith.constant 192 : index
    %24 = vector.load %arg7[%c0_16, %c192] : memref<16x512xf32, #tpu.memory_space<vmem>>, vector<16x32xf32>
    tpu.vector_store %arg7[%c0_16, %c192], %23 {strides = array<i32>} : memref<16x512xf32, #tpu.memory_space<vmem>>, vector<16x32xf32>,
    %25 = vector.extract_strided_slice %10 {offsets = [112, 0], sizes = [16, 32], strides = [1, 1]} : vector<256x32xf32> to vector<16x32xf32>
    %c0_17 = arith.constant 0 : index
    %c224 = arith.constant 224 : index
    %26 = vector.load %arg7[%c0_17, %c224] : memref<16x512xf32, #tpu.memory_space<vmem>>, vector<16x32xf32>
    tpu.vector_store %arg7[%c0_17, %c224], %25 {strides = array<i32>} : memref<16x512xf32, #tpu.memory_space<vmem>>, vector<16x32xf32>,
    %27 = vector.extract_strided_slice %10 {offsets = [128, 0], sizes = [16, 32], strides = [1, 1]} : vector<256x32xf32> to vector<16x32xf32>
    %c0_18 = arith.constant 0 : index
    %c256 = arith.constant 256 : index
    %28 = vector.load %arg7[%c0_18, %c256] : memref<16x512xf32, #tpu.memory_space<vmem>>, vector<16x32xf32>
    tpu.vector_store %arg7[%c0_18, %c256], %27 {strides = array<i32>} : memref<16x512xf32, #tpu.memory_space<vmem>>, vector<16x32xf32>,
    %29 = vector.extract_strided_slice %10 {offsets = [144, 0], sizes = [16, 32], strides = [1, 1]} : vector<256x32xf32> to vector<16x32xf32>
    %c0_19 = arith.constant 0 : index
    %c288 = arith.constant 288 : index
    %30 = vector.load %arg7[%c0_19, %c288] : memref<16x512xf32, #tpu.memory_space<vmem>>, vector<16x32xf32>
    tpu.vector_store %arg7[%c0_19, %c288], %29 {strides = array<i32>} : memref<16x512xf32, #tpu.memory_space<vmem>>, vector<16x32xf32>,
    %31 = vector.extract_strided_slice %10 {offsets = [160, 0], sizes = [16, 32], strides = [1, 1]} : vector<256x32xf32> to vector<16x32xf32>
    %c0_20 = arith.constant 0 : index
    %c320 = arith.constant 320 : index
    %32 = vector.load %arg7[%c0_20, %c320] : memref<16x512xf32, #tpu.memory_space<vmem>>, vector<16x32xf32>
    tpu.vector_store %arg7[%c0_20, %c320], %31 {strides = array<i32>} : memref<16x512xf32, #tpu.memory_space<vmem>>, vector<16x32xf32>,
    %33 = vector.extract_strided_slice %10 {offsets = [176, 0], sizes = [16, 32], strides = [1, 1]} : vector<256x32xf32> to vector<16x32xf32>
    %c0_21 = arith.constant 0 : index
    %c352 = arith.constant 352 : index
    %34 = vector.load %arg7[%c0_21, %c352] : memref<16x512xf32, #tpu.memory_space<vmem>>, vector<16x32xf32>
    tpu.vector_store %arg7[%c0_21, %c352], %33 {strides = array<i32>} : memref<16x512xf32, #tpu.memory_space<vmem>>, vector<16x32xf32>,
    %35 = vector.extract_strided_slice %10 {offsets = [192, 0], sizes = [16, 32], strides = [1, 1]} : vector<256x32xf32> to vector<16x32xf32>
    %c0_22 = arith.constant 0 : index
    %c384 = arith.constant 384 : index
    %36 = vector.load %arg7[%c0_22, %c384] : memref<16x512xf32, #tpu.memory_space<vmem>>, vector<16x32xf32>
    tpu.vector_store %arg7[%c0_22, %c384], %35 {strides = array<i32>} : memref<16x512xf32, #tpu.memory_space<vmem>>, vector<16x32xf32>,
    %37 = vector.extract_strided_slice %10 {offsets = [208, 0], sizes = [16, 32], strides = [1, 1]} : vector<256x32xf32> to vector<16x32xf32>
    %c0_23 = arith.constant 0 : index
    %c416 = arith.constant 416 : index
    %38 = vector.load %arg7[%c0_23, %c416] : memref<16x512xf32, #tpu.memory_space<vmem>>, vector<16x32xf32>
    tpu.vector_store %arg7[%c0_23, %c416], %37 {strides = array<i32>} : memref<16x512xf32, #tpu.memory_space<vmem>>, vector<16x32xf32>,
    %39 = vector.extract_strided_slice %10 {offsets = [224, 0], sizes = [16, 32], strides = [1, 1]} : vector<256x32xf32> to vector<16x32xf32>
    %c0_24 = arith.constant 0 : index
    %c448 = arith.constant 448 : index
    %40 = vector.load %arg7[%c0_24, %c448] : memref<16x512xf32, #tpu.memory_space<vmem>>, vector<16x32xf32>
    tpu.vector_store %arg7[%c0_24, %c448], %39 {strides = array<i32>} : memref<16x512xf32, #tpu.memory_space<vmem>>, vector<16x32xf32>,
    %41 = vector.extract_strided_slice %10 {offsets = [240, 0], sizes = [16, 32], strides = [1, 1]} : vector<256x32xf32> to vector<16x32xf32>
    %c0_25 = arith.constant 0 : index
    %c480 = arith.constant 480 : index
    %42 = vector.load %arg7[%c0_25, %c480] : memref<16x512xf32, #tpu.memory_space<vmem>>, vector<16x32xf32>
    tpu.vector_store %arg7[%c0_25, %c480], %41 {strides = array<i32>} : memref<16x512xf32, #tpu.memory_space<vmem>>, vector<16x32xf32>,
    %c0_26 = arith.constant 0 : index
    %c0_27 = arith.constant 0 : index
    %43 = vector.load %arg4[%c0_26, %c0_27] : memref<520x64xf32, #tpu.memory_space<vmem>>, vector<512x64xf32>
    %c512 = arith.constant 512 : index
    %c0_28 = arith.constant 0 : index
    %44 = vector.load %arg4[%c512, %c0_28] : memref<520x64xf32, #tpu.memory_space<vmem>>, vector<1x64xf32>
    %c0_29 = arith.constant 0 : index
    %c0_30 = arith.constant 0 : index
    %45 = vector.load %arg7[%c0_29, %c0_30] : memref<16x512xf32, #tpu.memory_space<vmem>>, vector<16x512xf32>
    %cst_31 = arith.constant dense<0.000000e+00> : vector<16x64xf32>
    %46 = tpu.matmul %45, %43, %cst_31 {dimension_numbers = #tpu.dot_dimension_numbers<[1], [0], [0], [1], [0, 0, 1, 1], [], []>} : vector<16x512xf32>, vector<512x64xf32>, vector<16x64xf32> -> vector<16x64xf32>
    %47 = vector.broadcast %44 : vector<1x64xf32> to vector<16x64xf32>
    %48 = arith.addf %46, %47 : vector<16x64xf32>
    %cst_32 = arith.constant 0.000000e+00 : f32
    %49 = vector.broadcast %cst_32 : f32 to vector<16x64xf32>
    %50 = arith.maximumf %48, %49 : vector<16x64xf32>
    %51 = vector.extract_strided_slice %50 {offsets = [0, 0], sizes = [1, 64], strides = [1, 1]} : vector<16x64xf32> to vector<1x64xf32>
    %c0_33 = arith.constant 0 : index
    %c0_34 = arith.constant 0 : index
    %52 = vector.load %arg8[%c0_33, %c0_34] : memref<1x1024xf32, #tpu.memory_space<vmem>>, vector<1x64xf32>
    tpu.vector_store %arg8[%c0_33, %c0_34], %51 {strides = array<i32>} : memref<1x1024xf32, #tpu.memory_space<vmem>>, vector<1x64xf32>,
    %53 = vector.extract_strided_slice %50 {offsets = [1, 0], sizes = [1, 64], strides = [1, 1]} : vector<16x64xf32> to vector<1x64xf32>
    %c0_35 = arith.constant 0 : index
    %c64_36 = arith.constant 64 : index
    %54 = vector.load %arg8[%c0_35, %c64_36] : memref<1x1024xf32, #tpu.memory_space<vmem>>, vector<1x64xf32>
    tpu.vector_store %arg8[%c0_35, %c64_36], %53 {strides = array<i32>} : memref<1x1024xf32, #tpu.memory_space<vmem>>, vector<1x64xf32>,
    %55 = vector.extract_strided_slice %50 {offsets = [2, 0], sizes = [1, 64], strides = [1, 1]} : vector<16x64xf32> to vector<1x64xf32>
    %c0_37 = arith.constant 0 : index
    %c128_38 = arith.constant 128 : index
    %56 = vector.load %arg8[%c0_37, %c128_38] : memref<1x1024xf32, #tpu.memory_space<vmem>>, vector<1x64xf32>
    tpu.vector_store %arg8[%c0_37, %c128_38], %55 {strides = array<i32>} : memref<1x1024xf32, #tpu.memory_space<vmem>>, vector<1x64xf32>,
    %57 = vector.extract_strided_slice %50 {offsets = [3, 0], sizes = [1, 64], strides = [1, 1]} : vector<16x64xf32> to vector<1x64xf32>
    %c0_39 = arith.constant 0 : index
    %c192_40 = arith.constant 192 : index
    %58 = vector.load %arg8[%c0_39, %c192_40] : memref<1x1024xf32, #tpu.memory_space<vmem>>, vector<1x64xf32>
    tpu.vector_store %arg8[%c0_39, %c192_40], %57 {strides = array<i32>} : memref<1x1024xf32, #tpu.memory_space<vmem>>, vector<1x64xf32>,
    %59 = vector.extract_strided_slice %50 {offsets = [4, 0], sizes = [1, 64], strides = [1, 1]} : vector<16x64xf32> to vector<1x64xf32>
    %c0_41 = arith.constant 0 : index
    %c256_42 = arith.constant 256 : index
    %60 = vector.load %arg8[%c0_41, %c256_42] : memref<1x1024xf32, #tpu.memory_space<vmem>>, vector<1x64xf32>
    tpu.vector_store %arg8[%c0_41, %c256_42], %59 {strides = array<i32>} : memref<1x1024xf32, #tpu.memory_space<vmem>>, vector<1x64xf32>,
    %61 = vector.extract_strided_slice %50 {offsets = [5, 0], sizes = [1, 64], strides = [1, 1]} : vector<16x64xf32> to vector<1x64xf32>
    %c0_43 = arith.constant 0 : index
    %c320_44 = arith.constant 320 : index
    %62 = vector.load %arg8[%c0_43, %c320_44] : memref<1x1024xf32, #tpu.memory_space<vmem>>, vector<1x64xf32>
    tpu.vector_store %arg8[%c0_43, %c320_44], %61 {strides = array<i32>} : memref<1x1024xf32, #tpu.memory_space<vmem>>, vector<1x64xf32>,
    %63 = vector.extract_strided_slice %50 {offsets = [6, 0], sizes = [1, 64], strides = [1, 1]} : vector<16x64xf32> to vector<1x64xf32>
    %c0_45 = arith.constant 0 : index
    %c384_46 = arith.constant 384 : index
    %64 = vector.load %arg8[%c0_45, %c384_46] : memref<1x1024xf32, #tpu.memory_space<vmem>>, vector<1x64xf32>
    tpu.vector_store %arg8[%c0_45, %c384_46], %63 {strides = array<i32>} : memref<1x1024xf32, #tpu.memory_space<vmem>>, vector<1x64xf32>,
    %65 = vector.extract_strided_slice %50 {offsets = [7, 0], sizes = [1, 64], strides = [1, 1]} : vector<16x64xf32> to vector<1x64xf32>
    %c0_47 = arith.constant 0 : index
    %c448_48 = arith.constant 448 : index
    %66 = vector.load %arg8[%c0_47, %c448_48] : memref<1x1024xf32, #tpu.memory_space<vmem>>, vector<1x64xf32>
    tpu.vector_store %arg8[%c0_47, %c448_48], %65 {strides = array<i32>} : memref<1x1024xf32, #tpu.memory_space<vmem>>, vector<1x64xf32>,
    %67 = vector.extract_strided_slice %50 {offsets = [8, 0], sizes = [1, 64], strides = [1, 1]} : vector<16x64xf32> to vector<1x64xf32>
    %c0_49 = arith.constant 0 : index
    %c512_50 = arith.constant 512 : index
    %68 = vector.load %arg8[%c0_49, %c512_50] : memref<1x1024xf32, #tpu.memory_space<vmem>>, vector<1x64xf32>
    tpu.vector_store %arg8[%c0_49, %c512_50], %67 {strides = array<i32>} : memref<1x1024xf32, #tpu.memory_space<vmem>>, vector<1x64xf32>,
    %69 = vector.extract_strided_slice %50 {offsets = [9, 0], sizes = [1, 64], strides = [1, 1]} : vector<16x64xf32> to vector<1x64xf32>
    %c0_51 = arith.constant 0 : index
    %c576 = arith.constant 576 : index
    %70 = vector.load %arg8[%c0_51, %c576] : memref<1x1024xf32, #tpu.memory_space<vmem>>, vector<1x64xf32>
    tpu.vector_store %arg8[%c0_51, %c576], %69 {strides = array<i32>} : memref<1x1024xf32, #tpu.memory_space<vmem>>, vector<1x64xf32>,
    %71 = vector.extract_strided_slice %50 {offsets = [10, 0], sizes = [1, 64], strides = [1, 1]} : vector<16x64xf32> to vector<1x64xf32>
    %c0_52 = arith.constant 0 : index
    %c640 = arith.constant 640 : index
    %72 = vector.load %arg8[%c0_52, %c640] : memref<1x1024xf32, #tpu.memory_space<vmem>>, vector<1x64xf32>
    tpu.vector_store %arg8[%c0_52, %c640], %71 {strides = array<i32>} : memref<1x1024xf32, #tpu.memory_space<vmem>>, vector<1x64xf32>,
    %73 = vector.extract_strided_slice %50 {offsets = [11, 0], sizes = [1, 64], strides = [1, 1]} : vector<16x64xf32> to vector<1x64xf32>
    %c0_53 = arith.constant 0 : index
    %c704 = arith.constant 704 : index
    %74 = vector.load %arg8[%c0_53, %c704] : memref<1x1024xf32, #tpu.memory_space<vmem>>, vector<1x64xf32>
    tpu.vector_store %arg8[%c0_53, %c704], %73 {strides = array<i32>} : memref<1x1024xf32, #tpu.memory_space<vmem>>, vector<1x64xf32>,
    %75 = vector.extract_strided_slice %50 {offsets = [12, 0], sizes = [1, 64], strides = [1, 1]} : vector<16x64xf32> to vector<1x64xf32>
    %c0_54 = arith.constant 0 : index
    %c768 = arith.constant 768 : index
    %76 = vector.load %arg8[%c0_54, %c768] : memref<1x1024xf32, #tpu.memory_space<vmem>>, vector<1x64xf32>
    tpu.vector_store %arg8[%c0_54, %c768], %75 {strides = array<i32>} : memref<1x1024xf32, #tpu.memory_space<vmem>>, vector<1x64xf32>,
    %77 = vector.extract_strided_slice %50 {offsets = [13, 0], sizes = [1, 64], strides = [1, 1]} : vector<16x64xf32> to vector<1x64xf32>
    %c0_55 = arith.constant 0 : index
    %c832 = arith.constant 832 : index
    %78 = vector.load %arg8[%c0_55, %c832] : memref<1x1024xf32, #tpu.memory_space<vmem>>, vector<1x64xf32>
    tpu.vector_store %arg8[%c0_55, %c832], %77 {strides = array<i32>} : memref<1x1024xf32, #tpu.memory_space<vmem>>, vector<1x64xf32>,
    %79 = vector.extract_strided_slice %50 {offsets = [14, 0], sizes = [1, 64], strides = [1, 1]} : vector<16x64xf32> to vector<1x64xf32>
    %c0_56 = arith.constant 0 : index
    %c896 = arith.constant 896 : index
    %80 = vector.load %arg8[%c0_56, %c896] : memref<1x1024xf32, #tpu.memory_space<vmem>>, vector<1x64xf32>
    tpu.vector_store %arg8[%c0_56, %c896], %79 {strides = array<i32>} : memref<1x1024xf32, #tpu.memory_space<vmem>>, vector<1x64xf32>,
    %81 = vector.extract_strided_slice %50 {offsets = [15, 0], sizes = [1, 64], strides = [1, 1]} : vector<16x64xf32> to vector<1x64xf32>
    %c0_57 = arith.constant 0 : index
    %c960 = arith.constant 960 : index
    %82 = vector.load %arg8[%c0_57, %c960] : memref<1x1024xf32, #tpu.memory_space<vmem>>, vector<1x64xf32>
    tpu.vector_store %arg8[%c0_57, %c960], %81 {strides = array<i32>} : memref<1x1024xf32, #tpu.memory_space<vmem>>, vector<1x64xf32>,
    %c256_58 = arith.constant 256 : index
    %c0_59 = arith.constant 0 : index
    %83 = vector.load %arg3[%c256_58, %c0_59] : memref<1288x32xf32, #tpu.memory_space<vmem>>, vector<1024x32xf32>
    %c0_60 = arith.constant 0 : index
    %c0_61 = arith.constant 0 : index
    %84 = vector.load %arg8[%c0_60, %c0_61] : memref<1x1024xf32, #tpu.memory_space<vmem>>, vector<1x1024xf32>
    %cst_62 = arith.constant dense<0.000000e+00> : vector<1x32xf32>
    %85 = tpu.matmul %84, %83, %cst_62 {dimension_numbers = #tpu.dot_dimension_numbers<[1], [0], [0], [1], [0, 0, 1, 1], [], []>} : vector<1x1024xf32>, vector<1024x32xf32>, vector<1x32xf32> -> vector<1x32xf32>
    %c0_63 = arith.constant 0 : index
    %c0_64 = arith.constant 0 : index
    %86 = vector.load %arg5[%c0_63, %c0_64] : memref<40x128xf32, #tpu.memory_space<vmem>>, vector<32x128xf32>
    %c32_65 = arith.constant 32 : index
    %c0_66 = arith.constant 0 : index
    %87 = vector.load %arg5[%c32_65, %c0_66] : memref<40x128xf32, #tpu.memory_space<vmem>>, vector<1x128xf32>
    %cst_67 = arith.constant dense<0.000000e+00> : vector<1x128xf32>
    %88 = tpu.matmul %85, %86, %cst_67 {dimension_numbers = #tpu.dot_dimension_numbers<[1], [0], [0], [1], [0, 0, 1, 1], [], []>} : vector<1x32xf32>, vector<32x128xf32>, vector<1x128xf32> -> vector<1x128xf32>
    %89 = arith.addf %88, %87 : vector<1x128xf32>
    %cst_68 = arith.constant 0.000000e+00 : f32
    %90 = vector.broadcast %cst_68 : f32 to vector<1x128xf32>
    %91 = arith.maximumf %89, %90 : vector<1x128xf32>
    %c0_69 = arith.constant 0 : index
    %c0_70 = arith.constant 0 : index
    %c0_71 = arith.constant 0 : index
    %92 = vector.load %arg6[%c0_69, %c0_70, %c0_71] : memref<1x1x128xf32, #tpu.memory_space<vmem>>, vector<1x1x128xf32>
    %93 = vector.shape_cast %92 : vector<1x1x128xf32> to vector<1x128xf32>
    %94 = vector.shape_cast %91 : vector<1x128xf32> to vector<1x1x128xf32>
    tpu.vector_store %arg6[%c0_69, %c0_70, %c0_71], %94 {strides = array<i32>} : memref<1x1x128xf32, #tpu.memory_space<vmem>>, vector<1x1x128xf32>,
    return
  }
  func.func @transform_0(%arg0: i32) -> (i32, i32, i32) {
    %c0_i32 = arith.constant 0 : i32
    %c0_i32_0 = arith.constant 0 : i32
    %c0_i32_1 = arith.constant 0 : i32
    return %arg0, %c0_i32, %c0_i32_0 : i32, i32, i32
  }
  func.func @transform_1(%arg0: i32) -> (i32, i32) {
    %c0_i32 = arith.constant 0 : i32
    %c0_i32_0 = arith.constant 0 : i32
    %c0_i32_1 = arith.constant 0 : i32
    return %c0_i32, %c0_i32_0 : i32, i32
  }
  func.func @transform_2(%arg0: i32) -> (i32, i32) {
    %c0_i32 = arith.constant 0 : i32
    %c0_i32_0 = arith.constant 0 : i32
    %c0_i32_1 = arith.constant 0 : i32
    return %c0_i32, %c0_i32_0 : i32, i32
  }
  func.func @transform_3(%arg0: i32) -> (i32, i32) {
    %c0_i32 = arith.constant 0 : i32
    %c0_i32_0 = arith.constant 0 : i32
    %c0_i32_1 = arith.constant 0 : i32
    return %c0_i32, %c0_i32_0 : i32, i32
  }
  func.func @transform_4(%arg0: i32) -> (i32, i32) {
    %c0_i32 = arith.constant 0 : i32
    %c0_i32_0 = arith.constant 0 : i32
    %c0_i32_1 = arith.constant 0 : i32
    return %c0_i32, %c0_i32_0 : i32, i32
  }
  func.func @transform_5(%arg0: i32) -> (i32, i32, i32) {
    %c0_i32 = arith.constant 0 : i32
    %c0_i32_0 = arith.constant 0 : i32
    %c0_i32_1 = arith.constant 0 : i32
    return %arg0, %c0_i32, %c0_i32_0 : i32, i32, i32
  }
}

</mosaic_0001>

<bundles_post_ra>
// kernel: fwd.1
= control target key start
LH: loop header
LB: loop body
LE: loop exit
PB: predicated region body
PF: predicated region fallthrough
CT: control target
= control target key end

     0   :  { %10 = vsyncpa [#allocation5], 0  ;;  %s3835_s0 = inlined_call_operand.vmem [shape: f32[2,88,256], index: 0, kind: input, shape index: {}]   ;;  %s3836_s1 = inlined_call_operand.vmem [shape: f32[256,88], index: 1, kind: input, shape index: {}]   ;;  %s3837_s2 = inlined_call_operand.vmem [shape: f32[1288,32], index: 2, kind: input, shape index: {}]   ;;  %s3838_s3 = inlined_call_operand.vmem [shape: f32[520,64], index: 3, kind: input, shape index: {}]   ;;  %s3839_s4 = inlined_call_operand.vmem [shape: f32[40,128], index: 4, kind: input, shape index: {}]   ;;  %s3840_s5 = inlined_call_operand.hbm [shape: f32[2,1,128], index: 5, kind: output, shape index: {}]  }
   0x1   :  { %12 = vsyncpa [#allocation5 + $0x1], 0  ;;  %s2730_s18 = smov 0   ;;  %s2732_s19 = smov 0  }
   0x2   :  { %s2734_s20 = smov 0   ;;  %s2736_s21 = smov 0  }
   0x3 LB: > { %s2751_s22 = sadd.s32 4294967295, %s2690_s21   ;;  %s1878_s23 = sadd.s32 4294967294, %s2690_s21   ;;  %s2690_s21 = sphi %s2736_s21, %s3850_s21   ;;  %s2686_s20 = sphi %s2734_s20, %s3849_s20   ;;  %s2682_s19 = sphi %s2732_s19, %s3848_s19   ;;  %s2678_s18 = sphi %s2730_s18, %s3847_s18  }
   0x4   : > { %s2755_s24 = sadd.s32 1, %s2690_s21   ;;  %s135_s25 = sadd.s32 1, %s2686_s20 }
   0x5   : > { %s132_s26 = ssub.s32 %s2690_s21, %s2755_s24  ;;  %p145_p0 = scmp.ne.s32.totalorder %s2686_s20, %s2682_s19 }
   0x6   : > { %p133_p1 = scmp.eq.s32.totalorder %s132_s26, 0  ;;  %p146_p2 = scmp.eq.s32.totalorder %s2751_s22, 1 }
   0x7   : > { %p151_p3 = scmp.ne.s32.totalorder %s2682_s19, %s2678_s18  ;;  %p152_p4 = scmp.eq.s32.totalorder %s1878_s23, 1 }
   0x8   : > { %s2766_s27 = scalar_select %p133_p1, %s2686_s20, %s135_s25  }
   0x9   : > { %p2768_p5 = por %p146_p2, %p145_p0  ;;  %p2772_p6 = por %p152_p4, %p151_p3 }
   0xa   : > { %p1881_p7 = scmp.ge.s32.totalorder %s2690_s21, 1  ;;  %p190_p8 = scmp.lt.s32.totalorder %s2690_s21, 3 }
   0xc   : > { %p191_p9 = pnand %p1881_p7, %p190_p8 }
   0xd   : > { %v238_v0 = vld [vmem:[%s3837_s2 + $0x80] sm:$0xff] (!%p191_p9)  ;;  %v239_v1 = vld [vmem:[%s3837_s2 + $0x88] sm:$0xff] (!%p191_p9)  ;;  %p217_p10 = scmp.lt.s32.totalorder (!%p191_p9), %s2751_s22, 1  ;;  %v240_v5 = vld [vmem:[%s3837_s2 + $0x90] sm:$0xff] (!%p191_p9)  ;;  %vm444_vm0 = vcmask (!%p191_p9), 719872   ;;  %vm766_vm1 = vcmask (!%p191_p9), 261120  }
   0xe   : > { %194 = sbr.rel (%p191_p9) target bundleno = 1555 (0x613), region = 40  ;;  %v222_v2 = vld [vmem:[%s3837_s2] sm:$0xff] (!%p191_p9)  ;;  %v2331_v3 = vpack.c.bf16 (!%p191_p9), %v239_v1, %v238_v0  ;;  %v223_v4 = vld [vmem:[%s3837_s2 + $0x8] sm:$0xff] (!%p191_p9)  ;;  %v241_v6 = vld [vmem:[%s3837_s2 + $0x98] sm:$0xff] (!%p191_p9)  ;;  %s2692_s6 = smov (!%p191_p9), 32   ;;  %vm777_vm2 = vcmask (!%p191_p9), 523520  }
   0xf   : > { %v2333_v7 = vpack.c.bf16 (!%p191_p9), %v223_v4, %v222_v2  ;;  %v2335_v8 = vpack.c.bf16 (!%p191_p9), %v241_v6, %v240_v5  ;;  %v224_v9 = vld [vmem:[%s3837_s2 + $0x10] sm:$0xff] (!%p191_p9)  ;;  %v225_v10 = vld [vmem:[%s3837_s2 + $0x18] sm:$0xff] (!%p191_p9)  ;;  %v242_v11 = vld [vmem:[%s3837_s2 + $0xa0] sm:$0xff] (!%p191_p9)  ;;  %s2693_s15 = smov (!%p191_p9), 64   ;;  %s2694_s17 = smov (!%p191_p9), 96   ;;  %vm788_vm3 = vcmask (!%p191_p9), 785920  }
  0x10   : > { %2332 = vmatprep.subr.bf16.mxu0 (!%p191_p9), %v2331_v3  ;;  %v243_v12 = vld [vmem:[%s3837_s2 + $0xa8] sm:$0xff] (!%p191_p9)  ;;  %v2337_v13 = vpack.c.bf16 (!%p191_p9), %v225_v10, %v224_v9  ;;  %v226_v15 = vld [vmem:[%s3837_s2 + $0x20] sm:$0xff] (!%p191_p9)  ;;  %v244_v17 = vld [vmem:[%s3837_s2 + $0xb0] sm:$0xff] (!%p191_p9)  ;;  %vm799_vm4 = vcmask (!%p191_p9), 1048320   ;;  %vm2697_vm9 = vmmov (!%p191_p9), 0   ;;  %s1918_s26 = sshll.u32 (!%p191_p9), %s2751_s22, 4 }
  0x11   : > { %2334 = vmatpush3.bf16.msra.mxu0 (!%p191_p9), %v2333_v7  ;;  %v2339_v14 = vpack.c.bf16 (!%p191_p9), %v243_v12, %v242_v11  ;;  %v227_v16 = vld [vmem:[%s3837_s2 + $0x28] sm:$0xff] (!%p191_p9)  ;;  %v245_v18 = vld [vmem:[%s3837_s2 + $0xb8] sm:$0xff] (!%p191_p9)  ;;  %v228_v21 = vld [vmem:[%s3837_s2 + $0x30] sm:$0xff] (!%p191_p9)  ;;  %s3793_s12 = scalar_lea.hbm (!%p191_p9), %s3840_s5, %s1918_s26 }
  0x12   : > { %2336 = vmatprep.subr.bf16.mxu0 (!%p191_p9), %v2335_v8  ;;  %v2341_v19 = vpack.c.bf16 (!%p191_p9), %v227_v16, %v226_v15  ;;  %v2343_v20 = vpack.c.bf16 (!%p191_p9), %v245_v18, %v244_v17  ;;  %v229_v22 = vld [vmem:[%s3837_s2 + $0x38] sm:$0xff] (!%p191_p9)  ;;  %v246_v23 = vld [vmem:[%s3837_s2 + $0xc0] sm:$0xff] (!%p191_p9)  ;;  %v247_v24 = vld [vmem:[%s3837_s2 + $0xc8] sm:$0xff] (!%p191_p9) }
  0x13   : > { %v2345_v26 = vpack.c.bf16 (!%p191_p9), %v229_v22, %v228_v21  ;;  %v2347_v27 = vpack.c.bf16 (!%p191_p9), %v247_v24, %v246_v23  ;;  %v230_v28 = vld [vmem:[%s3837_s2 + $0x40] sm:$0xff] (!%p191_p9)  ;;  %v231_v29 = vld [vmem:[%s3837_s2 + $0x48] sm:$0xff] (!%p191_p9)  ;;  %v248_v30 = vld [vmem:[%s3837_s2 + $0xd0] sm:$0xff] (!%p191_p9) }
  0x14   : > { %v249_v31 = vld [vmem:[%s3837_s2 + $0xd8] sm:$0xff] (!%p191_p9)  ;;  %v2349_v32 = vpack.c.bf16 (!%p191_p9), %v231_v29, %v230_v28  ;;  %v232_v34 = vld [vmem:[%s3837_s2 + $0x50] sm:$0xff] (!%p191_p9)  ;;  %v250_v36 = vld [vmem:[%s3837_s2 + $0xe0] sm:$0xff] (!%p191_p9) }
  0x15   : > { %s218_s7 = scalar_select %p217_p10, %s2751_s22, 1  ;;  %2338 = vmatpush3.bf16.msra.mxu0 %v2337_v13  ;;  %v2351_v33 = vpack.c.bf16 %v249_v31, %v248_v30  ;;  %v233_v35 = vld [vmem:[%s3837_s2 + $0x58] sm:$0xff]  ;;  %v251_v37 = vld [vmem:[%s3837_s2 + $0xe8] sm:$0xff]  ;;  %v234_v40 = vld [vmem:[%s3837_s2 + $0x60] sm:$0xff] }
  0x16   : > { %2340 = vmatprep.subr.bf16.mxu0 %v2339_v14  ;;  %v2353_v38 = vpack.c.bf16 %v233_v35, %v232_v34  ;;  %v2355_v39 = vpack.c.bf16 %v251_v37, %v250_v36  ;;  %v235_v41 = vld [vmem:[%s3837_s2 + $0x68] sm:$0xff]  ;;  %v252_v42 = vld [vmem:[%s3837_s2 + $0xf0] sm:$0xff]  ;;  %v253_v43 = vld [vmem:[%s3837_s2 + $0xf8] sm:$0xff]  ;;  %s2699_s22 = smov [#allocation4]  }
  0x17   : > { %s2581_s10 = smul.u32 176, %s218_s7  ;;  %v2357_v44 = vpack.c.bf16 %v235_v41, %v234_v40  ;;  %v2359_v45 = vpack.c.bf16 %v253_v43, %v252_v42  ;;  %v236_v46 = vld [vmem:[%s3837_s2 + $0x70] sm:$0xff]  ;;  %v237_v47 = vld [vmem:[%s3837_s2 + $0x78] sm:$0xff]  ;;  %v412_v6 = vld [vmem:[%s3836_s1] sm:$0xff]  ;;  %s2632_s14 = sshll.u32 %s2699_s22, 4  ;;  %s2633_s14 = int_to_ptr.vmem [resolvable:$false] %s2632_s14 }
  0x18   : > { %v2361_v48 = vpack.c.bf16 %v237_v47, %v236_v46  ;;  %2272 = vmatprep.mubr.msk.f32.mxu1 %vm444_vm0, %v412_v6  ;;  %v2910_v10 = vld [vmem:[%s3837_s2 + $0x500] ss:$0 sm:$0xff]  ;;  %v415_v6 = vld [vmem:[%s3836_s1 + $0x18] sm:$0xff] }
  0x19   : > { %s2825_s30 = scalar_lea.vmem %s3835_s0, %s2581_s10  ;;  %2342 = vmatpush3.bf16.msra.mxu0 %v2341_v19 }
  0x1a   : > { %v256_v25 = vld [vmem:[%s2825_s30 + $0x8] sm:$0xff]  ;;  %2344 = vmatprep.subr.bf16.mxu0 %v2343_v20  ;;  %v255_v49 = vld [vmem:[%s2825_s30] sm:$0xff]  ;;  %v258_v50 = vld [vmem:[%s2825_s30 + $0x18] sm:$0xff] }
  0x1b   : > { %345 = vmatprep.mubr.f32.mxu0 %v256_v25  ;;  %v257_v51 = vld [vmem:[%s2825_s30 + $0x10] sm:$0xff]  ;;  %v260_v52 = vld [vmem:[%s2825_s30 + $0x28] sm:$0xff]  ;;  %v259_v53 = vld [vmem:[%s2825_s30 + $0x20] sm:$0xff] }
  0x1c   : > { %v262_v54 = vld [vmem:[%s2825_s30 + $0x38] sm:$0xff]  ;;  %v261_v55 = vld [vmem:[%s2825_s30 + $0x30] sm:$0xff]  ;;  %v264_v56 = vld [vmem:[%s2825_s30 + $0x48] sm:$0xff] }
  0x1d   : > { %2346 = vmatpush3.bf16.msra.mxu0 %v2345_v26  ;;  %v263_v57 = vld [vmem:[%s2825_s30 + $0x40] sm:$0xff]  ;;  %v266_v58 = vld [vmem:[%s2825_s30 + $0x58] sm:$0xff]  ;;  %v265_v59 = vld [vmem:[%s2825_s30 + $0x50] sm:$0xff] }
  0x1e   : > { %2348 = vmatprep.subr.bf16.mxu0 %v2347_v27  ;;  %v268_v60 = vld [vmem:[%s2825_s30 + $0x68] sm:$0xff]  ;;  %v267_v61 = vld [vmem:[%s2825_s30 + $0x60] sm:$0xff]  ;;  %v270_v62 = vld [vmem:[%s2825_s30 + $0x78] sm:$0xff] }
  0x1f   : > { %v269_v63 = vld [vmem:[%s2825_s30 + $0x70] sm:$0xff]  ;;  %v272_v0 = vld [vmem:[%s2825_s30 + $0x88] sm:$0xff]  ;;  %v271_v1 = vld [vmem:[%s2825_s30 + $0x80] sm:$0xff] }
  0x20   : > { %v274_v2 = vld [vmem:[%s2825_s30 + $0x98] sm:$0xff]  ;;  %v273_v3 = vld [vmem:[%s2825_s30 + $0x90] sm:$0xff]  ;;  %v276_v4 = vld [vmem:[%s2825_s30 + $0xa8] sm:$0xff] }
  0x21   : > { %2350 = vmatpush3.bf16.msra.mxu0 %v2349_v32  ;;  %v275_v5 = vld [vmem:[%s2825_s30 + $0xa0] sm:$0xff]  ;;  %s2634_s30 = scalar_lea.vmem %s2633_s14, 32 }
  0x22   : > { %2352 = vmatprep.subr.bf16.mxu0 %v2351_v33 }
  0x25   : > { %2354 = vmatpush3.bf16.msra.mxu0 %v2353_v38 }
  0x26   : > { %2356 = vmatprep.subr.bf16.mxu0 %v2355_v39 }
  0x29   : > { %2358 = vmatpush3.bf16.msra.mxu0 %v2357_v44 }
  0x2a   : > { %2360 = vmatprep.subr.bf16.mxu0 %v2359_v45 }
  0x2d   : > { %2362 = vmatpush3.bf16.msra.mxu0 %v2361_v48 }
  0x30   : > { %346 = vmatmul.mubr.f32.vlgmr.msra.gmra.mrb[0].mxu0 %v255_v49 }
  0x31   : > { %350 = vmatprep.mubr.f32.mxu0 %v258_v50 }
  0x34   : > { %351 = vmatmul.mubr.f32.gmra.mrb[2].mxu0 %v257_v51 }
  0x35   : > { %355 = vmatprep.mubr.f32.mxu0 %v260_v52 }
  0x38   : > { %356 = vmatmul.mubr.f32.gmra.mrb[4].mxu0 %v259_v53 }
  0x39   : > { %360 = vmatprep.mubr.f32.mxu0 %v262_v54 }
  0x3c   : > { %361 = vmatmul.mubr.f32.gmra.mrb[6].mxu0 %v261_v55 }
  0x3d   : > { %365 = vmatprep.mubr.f32.mxu0 %v264_v56 }
  0x40   : > { %366 = vmatmul.mubr.f32.gmra.mrb[8].mxu0 %v263_v57 }
  0x41   : > { %370 = vmatprep.mubr.f32.mxu0 %v266_v58 }
  0x44   : > { %371 = vmatmul.mubr.f32.gmra.mrb[10].mxu0 %v265_v59 }
  0x45   : > { %375 = vmatprep.mubr.f32.mxu0 %v268_v60 }
  0x48   : > { %376 = vmatmul.mubr.f32.gmra.mrb[12].mxu0 %v267_v61 }
  0x49   : > { %380 = vmatprep.mubr.f32.mxu0 %v270_v62 }
  0x4c   : > { %381 = vmatmul.mubr.f32.gmra.mrb[14].mxu0 %v269_v63 }
  0x4d   : > { %385 = vmatprep.mubr.f32.mxu0 %v272_v0 }
  0x50   : > { %386 = vmatmul.mubr.f32.gmra.mrb[16].mxu0 %v271_v1 }
  0x51   : > { %390 = vmatprep.mubr.f32.mxu0 %v274_v2 }
  0x54   : > { %391 = vmatmul.mubr.f32.gmra.mrb[18].mxu0 %v273_v3 }
  0x55   : > { %395 = vmatprep.mubr.f32.mxu0 %v276_v4  ;;  %v413_v4 = vld [vmem:[%s3836_s1 + $0x8] sm:$0xff] }
  0x58   : > { %396 = vmatmul.mubr.f32.gmra.mrb[20].mxu0 %v275_v5  ;;  %v414_v5 = vld [vmem:[%s3836_s1 + $0x10] sm:$0xff] }
 0x103   : > { %v1953_v7 = vpop.f32.mrb[0].mxu0 }
 0x104   : > { %v1954_v8 = vpop.f32.mrb[1].mxu0 }
 0x105   : > { %v1955_v9 = vadd.f32 %v1954_v8, %v1953_v7  ;;  %v416_v7 = vld [vmem:[%s3836_s1 + $0x20] sm:$0xff]  ;;  %v417_v8 = vld [vmem:[%s3836_s1 + $0x28] sm:$0xff] }
 0x107   : > { %v1956_v11 = vpop.f32.mrb[2].mxu0  ;;  %v348_v13 = vadd.f32 %v1955_v9, %v2910_v10  ;;  %v418_v9 = vld [vmem:[%s3836_s1 + $0x30] sm:$0xff] }
 0x108   : > { %v1957_v12 = vpop.f32.mrb[3].mxu0 }
 0x109   : > { %v1958_v14 = vadd.f32 %v1957_v12, %v1956_v11  ;;  %v401_v18 = vmax.f32 %v348_v13, 0.0  ;;  %v420_v11 = vld [vmem:[%s3836_s1 + $0x40] sm:$0xff]  ;;  %v421_v12 = vld [vmem:[%s3836_s1 + $0x48] sm:$0xff]  ;;  %v422_v13 = vld [vmem:[%s3836_s1 + $0x50] sm:$0xff] }
 0x10b   : > { %v353_v15 = vadd.f32 %v1958_v14, %v2910_v10  ;;  %v1959_v16 = vpop.f32.mrb[4].mxu0  ;;  %v423_v14 = vld [vmem:[%s3836_s1 + $0x58] sm:$0xff] }
 0x10c   : > { %v1960_v17 = vpop.f32.mrb[5].mxu0 }
 0x10d   : > { %v402_v19 = vmax.f32 %v353_v15, 0.0  ;;  %v1961_v20 = vadd.f32 %v1960_v17, %v1959_v16  ;;  %v424_v15 = vld [vmem:[%s3836_s1 + $0x60] sm:$0xff]  ;;  %v425_v16 = vld [vmem:[%s3836_s1 + $0x68] sm:$0xff]  ;;  %v426_v17 = vld [vmem:[%s3836_s1 + $0x70] sm:$0xff] }
 0x10f   : > { %v1962_v21 = vpop.f32.mrb[6].mxu0  ;;  %v2363_v22 = vpack.c.bf16 %v402_v19, %v401_v18  ;;  %v358_v24 = vadd.f32 %v1961_v20, %v2910_v10  ;;  %v427_v18 = vld [vmem:[%s3836_s1 + $0x78] sm:$0xff]  ;;  %v428_v19 = vld [vmem:[%s3836_s1 + $0x80] sm:$0xff]  ;;  %v429_v20 = vld [vmem:[%s3836_s1 + $0x88] sm:$0xff] }
 0x110   : > { %v1963_v23 = vpop.f32.mrb[7].mxu0 }
 0x111   : > { %v1964_v25 = vadd.f32 %v1963_v23, %v1962_v21  ;;  %2364 = vmatprep.subr.bf16.mxu1 %v2363_v22  ;;  %v403_v29 = vmax.f32 %v358_v24, 0.0  ;;  %v430_v21 = vld [vmem:[%s3836_s1 + $0x90] sm:$0xff]  ;;  %v432_v23 = vld [vmem:[%s3836_s1 + $0xa0] sm:$0xff]  ;;  %v433_v24 = vld [vmem:[%s3836_s1 + $0xa8] sm:$0xff] }
 0x112   : > { %2366 = vmatpush3.bf16.msra.mxu1 %v2363_v22  ;;  %v431_v22 = vld [vmem:[%s3836_s1 + $0x98] sm:$0xff] }
 0x113   : > { %v363_v26 = vadd.f32 %v1964_v25, %v2910_v10  ;;  %v1965_v27 = vpop.f32.mrb[8].mxu0  ;;  %v434_v25 = vld [vmem:[%s3836_s1 + $0xb0] sm:$0xff] }
 0x114   : > { %v1966_v28 = vpop.f32.mrb[9].mxu0 }
 0x115   : > { %v404_v30 = vmax.f32 %v363_v26, 0.0  ;;  %v1967_v31 = vadd.f32 %v1966_v28, %v1965_v27  ;;  %v435_v26 = vld [vmem:[%s3836_s1 + $0xb8] sm:$0xff]  ;;  %v436_v27 = vld [vmem:[%s3836_s1 + $0xc0] sm:$0xff]  ;;  %v437_v28 = vld [vmem:[%s3836_s1 + $0xc8] sm:$0xff] }
 0x117   : > { %v1968_v32 = vpop.f32.mrb[10].mxu0  ;;  %v2367_v33 = vpack.c.bf16 %v404_v30, %v403_v29  ;;  %v368_v35 = vadd.f32 %v1967_v31, %v2910_v10  ;;  %v438_v29 = vld [vmem:[%s3836_s1 + $0xd0] sm:$0xff]  ;;  %v439_v30 = vld [vmem:[%s3836_s1 + $0xd8] sm:$0xff]  ;;  %v440_v31 = vld [vmem:[%s3836_s1 + $0xe0] sm:$0xff] }
 0x118   : > { %v1969_v34 = vpop.f32.mrb[11].mxu0 }
 0x119   : > { %v1970_v36 = vadd.f32 %v1969_v34, %v1968_v32  ;;  %2368 = vmatprep.subr.bf16.mxu1 %v2367_v33  ;;  %v405_v40 = vmax.f32 %v368_v35, 0.0  ;;  %v441_v32 = vld [vmem:[%s3836_s1 + $0xe8] sm:$0xff]  ;;  %v443_v34 = vld [vmem:[%s3836_s1 + $0xf8] sm:$0xff]  ;;  %v946_v35 = vld [vmem:[%s3838_s3 + $0x180] sm:$0xff] }
 0x11a   : > { %2370 = vmatpush3.bf16.msra.mxu1 %v2367_v33  ;;  %v442_v33 = vld [vmem:[%s3836_s1 + $0xf0] sm:$0xff] }
 0x11b   : > { %v373_v37 = vadd.f32 %v1970_v36, %v2910_v10  ;;  %v1971_v38 = vpop.f32.mrb[12].mxu0  ;;  %v947_v36 = vld [vmem:[%s3838_s3 + $0x188] sm:$0xff] }
 0x11c   : > { %v1972_v39 = vpop.f32.mrb[13].mxu0 }
 0x11d   : > { %v406_v41 = vmax.f32 %v373_v37, 0.0  ;;  %v1973_v42 = vadd.f32 %v1972_v39, %v1971_v38  ;;  %v930_v37 = vld [vmem:[%s3838_s3 + $0x100] sm:$0xff]  ;;  %v2415_v38 = vpack.c.bf16 %v947_v36, %v946_v35  ;;  %v931_v39 = vld [vmem:[%s3838_s3 + $0x108] sm:$0xff]  ;;  %v936_v36 = vld [vmem:[%s3838_s3 + $0x130] sm:$0xff] }
 0x11f   : > { %v1974_v43 = vpop.f32.mrb[14].mxu0  ;;  %v2371_v44 = vpack.c.bf16 %v406_v41, %v405_v40  ;;  %v378_v46 = vadd.f32 %v1973_v42, %v2910_v10  ;;  %v2417_v40 = vpack.c.bf16 %v931_v39, %v930_v37  ;;  %v914_v41 = vld [vmem:[%s3838_s3 + $0x80] sm:$0xff]  ;;  %v915_v42 = vld [vmem:[%s3838_s3 + $0x88] sm:$0xff]  ;;  %v937_v39 = vld [vmem:[%s3838_s3 + $0x138] sm:$0xff] }
 0x120   : > { %v1975_v45 = vpop.f32.mrb[15].mxu0 }
 0x121   : > { %v1976_v47 = vadd.f32 %v1975_v45, %v1974_v43  ;;  %2372 = vmatprep.subr.bf16.mxu1 %v2371_v44  ;;  %v407_v51 = vmax.f32 %v378_v46, 0.0  ;;  %v2383_v43 = vpack.c.bf16 %v915_v42, %v914_v41  ;;  %v899_v45 = vld [vmem:[%s3838_s3 + $0x8] sm:$0xff]  ;;  %v926_v41 = vld [vmem:[%s3838_s3 + $0xe0] sm:$0xff] }
 0x122   : > { %2374 = vmatpush3.bf16.msra.mxu1 %v2371_v44  ;;  %v898_v44 = vld [vmem:[%s3838_s3] sm:$0xff]  ;;  %v927_v42 = vld [vmem:[%s3838_s3 + $0xe8] sm:$0xff] }
 0x123   : > { %v383_v48 = vadd.f32 %v1976_v47, %v2910_v10  ;;  %v1977_v49 = vpop.f32.mrb[16].mxu0  ;;  %v2385_v46 = vpack.c.bf16 %v899_v45, %v898_v44  ;;  %2384 = vmatprep.subr.bf16.mxu0 %v2383_v43  ;;  %v916_v47 = vld [vmem:[%s3838_s3 + $0x90] sm:$0xff]  ;;  %v2407_v43 = vpack.c.bf16 %v927_v42, %v926_v41  ;;  %v910_v44 = vld [vmem:[%s3838_s3 + $0x60] sm:$0xff]  ;;  %v911_v45 = vld [vmem:[%s3838_s3 + $0x68] sm:$0xff] }
 0x124   : > { %v1978_v50 = vpop.f32.mrb[17].mxu0 }
 0x125   : > { %v408_v52 = vmax.f32 %v383_v48, 0.0  ;;  %v1979_v53 = vadd.f32 %v1978_v50, %v1977_v49  ;;  %2386 = vmatpush3.bf16.msra.mxu0 %v2385_v46  ;;  %v917_v48 = vld [vmem:[%s3838_s3 + $0x98] sm:$0xff]  ;;  %v900_v50 = vld [vmem:[%s3838_s3 + $0x10] sm:$0xff] }
 0x126   : > { %v2387_v49 = vpack.c.bf16 %v917_v48, %v916_v47  ;;  %v2409_v47 = vpack.c.bf16 %v911_v45, %v910_v44 }
 0x127   : > { %v1980_v54 = vpop.f32.mrb[18].mxu0  ;;  %v2375_v55 = vpack.c.bf16 %v408_v52, %v407_v51  ;;  %v388_v57 = vadd.f32 %v1979_v53, %v2910_v10  ;;  %v901_v51 = vld [vmem:[%s3838_s3 + $0x18] sm:$0xff]  ;;  %v948_v53 = vld [vmem:[%s3838_s3 + $0x190] sm:$0xff] }
 0x128   : > { %v1981_v56 = vpop.f32.mrb[19].mxu0  ;;  %2388 = vmatprep.subr.bf16.mxu0 %v2387_v49  ;;  %v928_v49 = vld [vmem:[%s3838_s3 + $0xf0] sm:$0xff] }
 0x129   : > { %v1982_v58 = vadd.f32 %v1981_v56, %v1980_v54  ;;  %2376 = vmatprep.subr.bf16.mxu1 %v2375_v55  ;;  %v409_v62 = vmax.f32 %v388_v57, 0.0  ;;  %v949_v54 = vld [vmem:[%s3838_s3 + $0x198] sm:$0xff]  ;;  %v932_v56 = vld [vmem:[%s3838_s3 + $0x110] sm:$0xff] }
 0x12a   : > { %2378 = vmatpush3.bf16.msra.mxu1 %v2375_v55  ;;  %v2389_v55 = vpack.c.bf16 %v901_v51, %v900_v50  ;;  %v929_v50 = vld [vmem:[%s3838_s3 + $0xf8] sm:$0xff] }
 0x12b   : > { %v393_v59 = vadd.f32 %v1982_v58, %v2910_v10  ;;  %v1983_v60 = vpop.f32.mrb[20].mxu0  ;;  %v2419_v58 = vpack.c.bf16 %v949_v54, %v948_v53  ;;  %v2411_v51 = vpack.c.bf16 %v929_v50, %v928_v49  ;;  %v913_v53 = vld [vmem:[%s3838_s3 + $0x78] sm:$0xff] }
 0x12c   : > { %v1984_v61 = vpop.f32.mrb[21].mxu0  ;;  %2390 = vmatpush3.bf16.msra.mxu0 %v2389_v55  ;;  %v954_v55 = vld [vmem:[%s3838_s3 + $0x1c0] sm:$0xff] }
 0x12d   : > { %v410_v63 = vmax.f32 %v393_v59, 0.0  ;;  %v1985_v0 = vadd.f32 %v1984_v61, %v1983_v60  ;;  %v933_v59 = vld [vmem:[%s3838_s3 + $0x118] sm:$0xff]  ;;  %v918_v61 = vld [vmem:[%s3838_s3 + $0xa0] sm:$0xff] }
 0x12e   : > { %v2421_v60 = vpack.c.bf16 %v933_v59, %v932_v56  ;;  %v955_v56 = vld [vmem:[%s3838_s3 + $0x1c8] sm:$0xff] }
 0x12f   : > { %v398_v1 = vadd.f32 %v1985_v0, %v2910_v10  ;;  %v2379_v2 = vpack.c.bf16 %v410_v63, %v409_v62  ;;  %v419_v10 = vld [vmem:[%s3836_s1 + $0x38] sm:$0xff]  ;;  %v919_v62 = vld [vmem:[%s3838_s3 + $0xa8] sm:$0xff]  ;;  %v902_v0 = vld [vmem:[%s3838_s3 + $0x20] sm:$0xff] }
 0x130   : > { %v2391_v63 = vpack.c.bf16 %v919_v62, %v918_v61  ;;  %v939_v61 = vld [vmem:[%s3838_s3 + $0x148] sm:$0xff] }
 0x131   : > { %v411_v3 = vmax.f32 %v398_v1, 0.0  ;;  %2380 = vmatprep.subr.bf16.mxu1 %v2379_v2  ;;  %v903_v1 = vld [vmem:[%s3838_s3 + $0x28] sm:$0xff] }
 0x132   : > { %2382 = vmatpush3.bf16.msra.mxu1 %v2379_v2  ;;  %2392 = vmatprep.subr.bf16.mxu0 %v2391_v63 }
 0x133   : > { %2270 = vmatprep.subr.mxu1 %v411_v3 }
 0x136   : > { %2271 = vmatpush3.msra.mxu1 %v411_v3  ;;  %v2393_v3 = vpack.c.bf16 %v903_v1, %v902_v0 }
 0x137   : > { %2273 = vmatmul.mubr.msk.f32.vlgmr.msra.gmra.mrb[0].mxu1 %vm444_vm0, %v413_v4  ;;  %2416 = vmatprep.subr.bf16.mxu1 %v2415_v38 }
 0x138   : > { %2275 = vmatprep.mubr.msk.f32.mxu1 %vm444_vm0, %v414_v5  ;;  %2418 = vmatpush3.bf16.msra.mxu1 %v2417_v40  ;;  %v920_v5 = vld [vmem:[%s3838_s3 + $0xb0] sm:$0xff]  ;;  %v2429_v40 = vpack.c.bf16 %v937_v39, %v936_v36 }
 0x139   : > { %2420 = vmatprep.subr.bf16.mxu1 %v2419_v58  ;;  %2394 = vmatpush3.bf16.msra.mxu0 %v2393_v3  ;;  %v938_v58 = vld [vmem:[%s3838_s3 + $0x140] sm:$0xff]  ;;  %v956_v3 = vld [vmem:[%s3838_s3 + $0x1d0] sm:$0xff] }
 0x13a   : > { %v2433_v62 = vpack.c.bf16 %v939_v61, %v938_v58 }
 0x13b   : > { %2276 = vmatmul.mubr.msk.f32.gmra.mrb[2].mxu1 %vm444_vm0, %v415_v6  ;;  %v921_v6 = vld [vmem:[%s3838_s3 + $0xb8] sm:$0xff] }
 0x13c   : > { %2278 = vmatprep.mubr.msk.f32.mxu1 %vm444_vm0, %v416_v7  ;;  %2422 = vmatpush3.bf16.msra.mxu1 %v2421_v60  ;;  %v2395_v7 = vpack.c.bf16 %v921_v6, %v920_v5  ;;  %v2431_v60 = vpack.c.bf16 %v955_v56, %v954_v55  ;;  %v940_v5 = vld [vmem:[%s3838_s3 + $0x150] sm:$0xff] }
 0x13e   : > { %2396 = vmatprep.subr.bf16.mxu0 %v2395_v7  ;;  %v941_v7 = vld [vmem:[%s3838_s3 + $0x158] sm:$0xff] }
 0x13f   : > { %2279 = vmatmul.mubr.msk.f32.gmra.mrb[4].mxu1 %vm444_vm0, %v417_v8  ;;  %v904_v8 = vld [vmem:[%s3838_s3 + $0x30] sm:$0xff] }
 0x140   : > { %2281 = vmatprep.mubr.msk.f32.mxu1 %vm444_vm0, %v418_v9  ;;  %v905_v9 = vld [vmem:[%s3838_s3 + $0x38] sm:$0xff] }
 0x143   : > { %2282 = vmatmul.mubr.msk.f32.gmra.mrb[6].mxu1 %vm444_vm0, %v419_v10 }
 0x144   : > { %2284 = vmatprep.mubr.msk.f32.mxu1 %vm444_vm0, %v420_v11  ;;  %v2397_v11 = vpack.c.bf16 %v905_v9, %v904_v8  ;;  %v2437_v8 = vpack.c.bf16 %v941_v7, %v940_v5  ;;  %v1328_v5 = vld [vmem:[%s3837_s2 + $0x280] sm:$0xff]  ;;  %v1329_v7 = vld [vmem:[%s3837_s2 + $0x288] sm:$0xff] }
 0x146   : > { %2398 = vmatpush3.bf16.msra.mxu0 %v2397_v11 }
 0x147   : > { %2285 = vmatmul.mubr.msk.f32.gmra.mrb[8].mxu1 %vm444_vm0, %v421_v12 }
 0x148   : > { %2287 = vmatprep.mubr.msk.f32.mxu1 %vm444_vm0, %v422_v13  ;;  %v950_v13 = vld [vmem:[%s3838_s3 + $0x1a0] sm:$0xff] }
 0x14b   : > { %2288 = vmatmul.mubr.msk.f32.gmra.mrb[10].mxu1 %vm444_vm0, %v423_v14  ;;  %v951_v14 = vld [vmem:[%s3838_s3 + $0x1a8] sm:$0xff] }
 0x14c   : > { %2290 = vmatprep.mubr.msk.f32.mxu1 %vm444_vm0, %v424_v15  ;;  %v2423_v15 = vpack.c.bf16 %v951_v14, %v950_v13  ;;  %v959_v13 = vld [vmem:[%s3838_s3 + $0x1e8] sm:$0xff]  ;;  %v942_v14 = vld [vmem:[%s3838_s3 + $0x160] sm:$0xff] }
 0x14e   : > { %2424 = vmatprep.subr.bf16.mxu1 %v2423_v15 }
 0x14f   : > { %2291 = vmatmul.mubr.msk.f32.gmra.mrb[12].mxu1 %vm444_vm0, %v425_v16  ;;  %v934_v16 = vld [vmem:[%s3838_s3 + $0x120] sm:$0xff] }
 0x150   : > { %2293 = vmatprep.mubr.msk.f32.mxu1 %vm444_vm0, %v426_v17  ;;  %v935_v17 = vld [vmem:[%s3838_s3 + $0x128] sm:$0xff] }
 0x153   : > { %2294 = vmatmul.mubr.msk.f32.gmra.mrb[14].mxu1 %vm444_vm0, %v427_v18  ;;  %v922_v18 = vld [vmem:[%s3838_s3 + $0xc0] sm:$0xff] }
 0x154   : > { %2296 = vmatprep.mubr.msk.f32.mxu1 %vm444_vm0, %v428_v19  ;;  %v2425_v19 = vpack.c.bf16 %v935_v17, %v934_v16  ;;  %v943_v17 = vld [vmem:[%s3838_s3 + $0x168] sm:$0xff] }
 0x156   : > { %2426 = vmatpush3.bf16.msra.mxu1 %v2425_v19 }
 0x157   : > { %2297 = vmatmul.mubr.msk.f32.gmra.mrb[16].mxu1 %vm444_vm0, %v429_v20  ;;  %v923_v20 = vld [vmem:[%s3838_s3 + $0xc8] sm:$0xff] }
 0x158   : > { %2299 = vmatprep.mubr.msk.f32.mxu1 %vm444_vm0, %v430_v21  ;;  %v906_v21 = vld [vmem:[%s3838_s3 + $0x40] sm:$0xff] }
 0x15b   : > { %2300 = vmatmul.mubr.msk.f32.gmra.mrb[18].mxu1 %vm444_vm0, %v431_v22  ;;  %v907_v22 = vld [vmem:[%s3838_s3 + $0x48] sm:$0xff] }
 0x15c   : > { %2302 = vmatprep.mubr.msk.f32.mxu1 %vm444_vm0, %v432_v23 }
 0x15f   : > { %2303 = vmatmul.mubr.msk.f32.gmra.mrb[20].mxu1 %vm444_vm0, %v433_v24  ;;  %v2399_v24 = vpack.c.bf16 %v923_v20, %v922_v18  ;;  %v2441_v18 = vpack.c.bf16 %v943_v17, %v942_v14  ;;  %v1298_v14 = vld [vmem:[%s3837_s2 + $0x190] sm:$0xff] }
 0x160   : > { %2305 = vmatprep.mubr.msk.f32.mxu1 %vm444_vm0, %v434_v25  ;;  %v2401_v25 = vpack.c.bf16 %v907_v22, %v906_v21  ;;  %v1330_v17 = vld [vmem:[%s3837_s2 + $0x290] sm:$0xff] }
 0x161   : > { %2400 = vmatprep.subr.bf16.mxu0 %v2399_v24  ;;  %v961_v24 = vld [vmem:[%s3838_s3 + $0x1f8] sm:$0xff] }
 0x162   : > { %2402 = vmatpush3.bf16.msra.mxu0 %v2401_v25  ;;  %v944_v25 = vld [vmem:[%s3838_s3 + $0x170] sm:$0xff] }
 0x163   : > { %2306 = vmatmul.mubr.msk.f32.gmra.mrb[22].mxu1 %vm444_vm0, %v435_v26 }
 0x164   : > { %2308 = vmatprep.mubr.msk.f32.mxu1 %vm444_vm0, %v436_v27  ;;  %v924_v27 = vld [vmem:[%s3838_s3 + $0xd0] sm:$0xff] }
 0x167   : > { %2309 = vmatmul.mubr.msk.f32.gmra.mrb[24].mxu1 %vm444_vm0, %v437_v28  ;;  %v925_v28 = vld [vmem:[%s3838_s3 + $0xd8] sm:$0xff] }
 0x168   : > { %2311 = vmatprep.mubr.msk.f32.mxu1 %vm444_vm0, %v438_v29  ;;  %v2403_v29 = vpack.c.bf16 %v925_v28, %v924_v27  ;;  %v945_v27 = vld [vmem:[%s3838_s3 + $0x178] sm:$0xff] }
 0x169   : > { %v2445_v28 = vpack.c.bf16 %v945_v27, %v944_v25  ;;  %v1315_v25 = vld [vmem:[%s3837_s2 + $0x218] sm:$0xff] }
 0x16a   : > { %2404 = vmatprep.subr.bf16.mxu0 %v2403_v29 }
 0x16b   : > { %2312 = vmatmul.mubr.msk.f32.gmra.mrb[26].mxu1 %vm444_vm0, %v439_v30  ;;  %v908_v30 = vld [vmem:[%s3838_s3 + $0x50] sm:$0xff] }
 0x16c   : > { %2314 = vmatprep.mubr.msk.f32.mxu1 %vm444_vm0, %v440_v31  ;;  %v909_v31 = vld [vmem:[%s3838_s3 + $0x58] sm:$0xff] }
 0x16d   : > { %v2405_v35 = vpack.c.bf16 %v909_v31, %v908_v30 }
 0x16f   : > { %2315 = vmatmul.mubr.msk.f32.gmra.mrb[28].mxu1 %vm444_vm0, %v441_v32  ;;  %2406 = vmatpush3.bf16.msra.mxu0 %v2405_v35 }
 0x170   : > { %2317 = vmatprep.mubr.msk.f32.mxu1 %vm444_vm0, %v442_v33  ;;  %v952_v33 = vld [vmem:[%s3838_s3 + $0x1b0] sm:$0xff]  ;;  %2408 = vmatprep.subr.bf16.mxu0 %v2407_v43 }
 0x173   : > { %2318 = vmatmul.mubr.msk.f32.gmra.mrb[30].mxu1 %vm444_vm0, %v443_v34  ;;  %v953_v34 = vld [vmem:[%s3838_s3 + $0x1b8] sm:$0xff]  ;;  %2410 = vmatpush3.bf16.msra.mxu0 %v2409_v47 }
 0x174   : > { %v2427_v38 = vpack.c.bf16 %v953_v34, %v952_v33  ;;  %2412 = vmatprep.subr.bf16.mxu0 %v2411_v51 }
 0x176   : > { %2428 = vmatprep.subr.bf16.mxu1 %v2427_v38 }
 0x177   : > { %2430 = vmatpush3.bf16.msra.mxu1 %v2429_v40 }
 0x178   : > { %2432 = vmatprep.subr.bf16.mxu1 %v2431_v60 }
 0x17b   : > { %2434 = vmatpush3.bf16.msra.mxu1 %v2433_v62 }
 0x20a   : > { %v2274_v52 = vpop.f32.mrb[0].mxu1 }
 0x20b   : > { %768 = vst.msk [vmem:[#allocation2 + $0x20] sm:$0xff] %vm766_vm1, %v2274_v52  ;;  %v607_v57 = vpop.f32.mrb[1].mxu1  ;;  %v912_v52 = vld [vmem:[%s3838_s3 + $0x70] sm:$0xff] }
 0x20c   : > { %767 = vst.msk [vmem:[#allocation2] sm:$0xff] %vm766_vm1, %v607_v57  ;;  %v2413_v57 = vpack.c.bf16 %v913_v53, %v912_v52 }
 0x20e   : > { %v2277_v2 = vpop.f32.mrb[2].mxu1  ;;  %2414 = vmatpush3.bf16.msra.mxu0 %v2413_v57 }
 0x20f   : > { %773 = vrot.lane.b32.xlu0 %v2277_v2, %s2692_s6  ;;  %v617_v4 = vpop.f32.mrb[3].mxu1 }
 0x212   : > { %v2280_v10 = vpop.f32.mrb[4].mxu1 }
 0x213   : > { %771 = vrot.lane.b32.xlu0 %v617_v4, %s2692_s6  ;;  %784 = vrot.lane.b32.xlu1 %v2280_v10, %s2693_s15  ;;  %v627_v12 = vpop.f32.mrb[5].mxu1  ;;  %v957_v4 = vld [vmem:[%s3838_s3 + $0x1d8] sm:$0xff] }
 0x214   : > { %v2435_v6 = vpack.c.bf16 %v957_v4, %v956_v3  ;;  %v1296_v3 = vld [vmem:[%s3837_s2 + $0x180] sm:$0xff]  ;;  %v1297_v4 = vld [vmem:[%s3837_s2 + $0x188] sm:$0xff] }
 0x216   : > { %v2283_v23 = vpop.f32.mrb[6].mxu1  ;;  %2436 = vmatprep.subr.bf16.mxu1 %v2435_v6  ;;  %v2447_v6 = vpack.c.bf16 %v1297_v4, %v1296_v3  ;;  %v1319_v3 = vld [vmem:[%s3837_s2 + $0x238] sm:$0xff]  ;;  %v1369_v4 = vld [vmem:[%s3837_s2 + $0x3c8] sm:$0xff] }
 0x217   : > { %782 = vrot.lane.b32.xlu1 %v627_v12, %s2693_s15  ;;  %795 = vrot.lane.b32.xlu0 %v2283_v23, %s2694_s17  ;;  %v637_v26 = vpop.f32.mrb[7].mxu1  ;;  %v958_v12 = vld [vmem:[%s3838_s3 + $0x1e0] sm:$0xff]  ;;  %v960_v23 = vld [vmem:[%s3838_s3 + $0x1f0] sm:$0xff] }
 0x218   : > { %2438 = vmatpush3.bf16.msra.mxu1 %v2437_v8  ;;  %v2439_v16 = vpack.c.bf16 %v959_v13, %v958_v12  ;;  %v1280_v8 = vld [vmem:[%s3837_s2 + $0x100] sm:$0xff]  ;;  %v1313_v13 = vld [vmem:[%s3837_s2 + $0x208] sm:$0xff]  ;;  %2448 = vmatprep.subr.bf16.mxu0 %v2447_v6 }
 0x219   : > { %v1312_v12 = vld [vmem:[%s3837_s2 + $0x200] sm:$0xff] }
 0x21a   : > { %v2286_v32 = vpop.f32.mrb[8].mxu1  ;;  %2440 = vmatprep.subr.bf16.mxu1 %v2439_v16  ;;  %v1299_v16 = vld [vmem:[%s3837_s2 + $0x198] sm:$0xff] }
 0x21b   : > { %803 = vst.msk [vmem:[#allocation2 + $0x28] sm:$0xff] %vm766_vm1, %v2286_v32  ;;  %793 = vrot.lane.b32.xlu0 %v637_v26, %s2694_s17  ;;  %v647_v37 = vpop.f32.mrb[9].mxu1  ;;  %v2443_v26 = vpack.c.bf16 %v961_v24, %v960_v23  ;;  %v1314_v23 = vld [vmem:[%s3837_s2 + $0x210] sm:$0xff] }
 0x21c   : > { %802 = vst.msk [vmem:[#allocation2 + $0x8] sm:$0xff] %vm766_vm1, %v647_v37  ;;  %2442 = vmatpush3.bf16.msra.mxu1 %v2441_v18  ;;  %v1331_v18 = vld [vmem:[%s3837_s2 + $0x298] sm:$0xff] }
 0x21d   : > { %2444 = vmatprep.subr.bf16.mxu1 %v2443_v26  ;;  %v2485_v26 = vpack.c.bf16 %v1315_v25, %v1314_v23 }
 0x21e   : > { %v2289_v46 = vpop.f32.mrb[10].mxu1 }
 0x21f   : > { %808 = vrot.lane.b32.xlu1 %v2289_v46, %s2692_s6  ;;  %v657_v48 = vpop.f32.mrb[11].mxu1 }
 0x220   : > { %806 = vrot.lane.b32.xlu0 %v657_v48, %s2692_s6  ;;  %2446 = vmatpush3.bf16.msra.mxu1 %v2445_v28 }
 0x222   : > { %v2292_v54 = vpop.f32.mrb[12].mxu1 }
 0x223   : > { %818 = vrot.lane.b32.xlu1 %v2292_v54, %s2693_s15  ;;  %v667_v59 = vpop.f32.mrb[13].mxu1 }
 0x226   : > { %v2295_v63 = vpop.f32.mrb[14].mxu1 }
 0x227   : > { %816 = vrot.lane.b32.xlu1 %v667_v59, %s2693_s15  ;;  %828 = vrot.lane.b32.xlu0 %v2295_v63, %s2694_s17  ;;  %v677_v0 = vpop.f32.mrb[15].mxu1 }
 0x22a   : > { %v2298_v1 = vpop.f32.mrb[16].mxu1 }
 0x22b   : > { %835 = vst.msk [vmem:[#allocation2 + $0x30] sm:$0xff] %vm766_vm1, %v2298_v1  ;;  %826 = vrot.lane.b32.xlu0 %v677_v0, %s2694_s17  ;;  %v687_v2 = vpop.f32.mrb[17].mxu1 }
 0x22c   : > { %834 = vst.msk [vmem:[#allocation2 + $0x10] sm:$0xff] %vm766_vm1, %v687_v2 }
 0x22e   : > { %v2301_v9 = vpop.f32.mrb[18].mxu1 }
 0x22f   : > { %840 = vrot.lane.b32.xlu1 %v2301_v9, %s2692_s6  ;;  %v697_v10 = vpop.f32.mrb[19].mxu1  ;;  %v1281_v9 = vld [vmem:[%s3837_s2 + $0x108] sm:$0xff] }
 0x232   : > { %v2304_v11 = vpop.f32.mrb[20].mxu1 }
 0x233   : > { %838 = vrot.lane.b32.xlu1 %v697_v10, %s2692_s6  ;;  %v707_v15 = vpop.f32.mrb[21].mxu1  ;;  %v2479_v10 = vpack.c.bf16 %v1329_v7, %v1328_v5  ;;  %v1304_v7 = vld [vmem:[%s3837_s2 + $0x1c0] sm:$0xff] }
 0x234   : > { %848 = vrot.lane.b32.xlu0 %v707_v15, %s2693_s15  ;;  %v2481_v15 = vpack.c.bf16 %v1313_v13, %v1312_v12  ;;  %v1337_v12 = vld [vmem:[%s3837_s2 + $0x2c8] sm:$0xff]  ;;  %v1288_v13 = vld [vmem:[%s3837_s2 + $0x140] sm:$0xff] }
 0x235   : > { %2480 = vmatprep.subr.bf16.mxu1 %v2479_v10 }
 0x236   : > { %v2307_v19 = vpop.f32.mrb[22].mxu1 }
 0x237   : > { %v717_v20 = vpop.f32.mrb[23].mxu1 }
 0x238   : > { %858 = vrot.lane.b32.xlu0 %v717_v20, %s2694_s17  ;;  %v2483_v20 = vpack.c.bf16 %v1331_v18, %v1330_v17 }
 0x23a   : > { %v2310_v21 = vpop.f32.mrb[24].mxu1 }
 0x23b   : > { %867 = vst.msk [vmem:[#allocation2 + $0x38] sm:$0xff] %vm766_vm1, %v2310_v21  ;;  %v727_v22 = vpop.f32.mrb[25].mxu1  ;;  %v1282_v21 = vld [vmem:[%s3837_s2 + $0x110] sm:$0xff] }
 0x23c   : > { %866 = vst.msk [vmem:[#allocation2 + $0x18] sm:$0xff] %vm766_vm1, %v727_v22  ;;  %v1283_v22 = vld [vmem:[%s3837_s2 + $0x118] sm:$0xff] }
 0x23d   : > { %v2453_v24 = vpack.c.bf16 %v1283_v22, %v1282_v21  ;;  %v1321_v21 = vld [vmem:[%s3837_s2 + $0x248] sm:$0xff] }
 0x23e   : > { %v2313_v29 = vpop.f32.mrb[26].mxu1 }
 0x23f   : > { %872 = vrot.lane.b32.xlu1 %v2313_v29, %s2692_s6  ;;  %v737_v30 = vpop.f32.mrb[27].mxu1 }
 0x242   : > { %v2316_v31 = vpop.f32.mrb[28].mxu1 }
 0x243   : > { %870 = vrot.lane.b32.xlu1 %v737_v30, %s2692_s6  ;;  %v747_v32 = vpop.f32.mrb[29].mxu1 }
 0x244   : > { %880 = vrot.lane.b32.xlu0 %v747_v32, %s2693_s15 }
 0x246   : > { %v2319_v33 = vpop.f32.mrb[30].mxu1 }
 0x247   : > { %v757_v34 = vpop.f32.mrb[31].mxu1 }
 0x248   : > { %882 = vrot.lane.b32.xlu0 %v2316_v31, %s2693_s15  ;;  %890 = vrot.lane.b32.xlu1 %v757_v34, %s2694_s17  ;;  %v2695_v34 = vmov 1966171168  }
 0x24c   : > { %892 = vrot.lane.b32.xlu0 %v2319_v33, %s2694_s17  ;;  %850 = vrot.lane.b32.xlu1 %v2304_v11, %s2693_s15  ;;  %v2449_v11 = vpack.c.bf16 %v1281_v9, %v1280_v8  ;;  %v1127_v33 = vlaneseq  ;;  %v1305_v8 = vld [vmem:[%s3837_s2 + $0x1c8] sm:$0xff]  ;;  %v1336_v9 = vld [vmem:[%s3837_s2 + $0x2c0] sm:$0xff] }
 0x24d   : > { %v2495_v18 = vpack.c.bf16 %v1337_v12, %v1336_v9  ;;  %v1343_v9 = vld [vmem:[%s3837_s2 + $0x2f8] sm:$0xff] }
 0x24e   : > { %vm3403_vm5 = vcmp.lt.s32.totalorder %v1127_v33, 64  ;;  %vm1158_vm6 = vcmp.ge.s32.totalorder %v1127_v33, 64  ;;  %vm1159_vm7 = vcmp.lt.s32.totalorder %v1127_v33, 128 }
 0x24f   : > { %vm3554_vm8 = vmand %vm1158_vm6, %vm1159_vm7 }
 0x250   : > { %860 = vrot.lane.b32.xlu1 %v2307_v19, %s2694_s17  ;;  %v2451_v19 = vpack.c.bf16 %v1299_v16, %v1298_v14  ;;  %v1289_v14 = vld [vmem:[%s3837_s2 + $0x148] sm:$0xff] }
 0x281   : > { %v774_v35 = vpop.permute.xlu0 %773 }
 0x282   : > { %779 = vst.msk [vmem:[#allocation2 + $0x20] sm:$0xff] %vm777_vm2, %v774_v35  ;;  %v1134_v35 = vunpack.c.l.s4 %v2695_v34  ;;  %v1339_v34 = vld [vmem:[%s3837_s2 + $0x2d8] sm:$0xff] }
 0x285   : > { %v772_v36 = vpop.permute.xlu0 %771  ;;  %v785_v37 = vpop.permute.xlu1 %784 }
 0x286   : > { %778 = vst.msk [vmem:[#allocation2] sm:$0xff] %vm777_vm2, %v772_v36  ;;  %v1916_v36 = vld [vmem:[%s3838_s3 + $0x200] ss:$0 sm:$0xff] }
 0x287   : > { %790 = vst.msk [vmem:[#allocation2 + $0x20] sm:$0xff] %vm788_vm3, %v785_v37  ;;  %v1300_v37 = vld [vmem:[%s3837_s2 + $0x1a0] sm:$0xff] }
 0x289   : > { %v783_v38 = vpop.permute.xlu1 %782  ;;  %v796_v39 = vpop.permute.xlu0 %795 }
 0x28a   : > { %789 = vst.msk [vmem:[#allocation2] sm:$0xff] %vm788_vm3, %v783_v38  ;;  %v1301_v38 = vld [vmem:[%s3837_s2 + $0x1a8] sm:$0xff] }
 0x28b   : > { %801 = vst.msk [vmem:[#allocation2 + $0x20] sm:$0xff] %vm799_vm4, %v796_v39  ;;  %v1332_v39 = vld [vmem:[%s3837_s2 + $0x2a0] sm:$0xff] }
 0x28d   : > { %v794_v40 = vpop.permute.xlu0 %793 }
 0x28e   : > { %800 = vst.msk [vmem:[#allocation2] sm:$0xff] %vm799_vm4, %v794_v40  ;;  %v2455_v40 = vpack.c.bf16 %v1301_v38, %v1300_v37 }
 0x291   : > { %v809_v41 = vpop.permute.xlu1 %808 }
 0x292   : > { %813 = vst.msk [vmem:[#allocation2 + $0x28] sm:$0xff] %vm777_vm2, %v809_v41  ;;  %v807_v42 = vpop.permute.xlu0 %806  ;;  %v967_v54 = vld [vmem:[#allocation2 + $0x20] sm:$0xff]  ;;  %v1333_v41 = vld [vmem:[%s3837_s2 + $0x2a8] sm:$0xff] }
 0x293   : > { %812 = vst.msk [vmem:[#allocation2 + $0x8] sm:$0xff] %vm777_vm2, %v807_v42  ;;  %v1284_v42 = vld [vmem:[%s3837_s2 + $0x120] sm:$0xff] }
 0x295   : > { %v819_v43 = vpop.permute.xlu1 %818  ;;  %v963_v51 = vld [vmem:[#allocation2] sm:$0xff] }
 0x296   : > { %823 = vst.msk [vmem:[#allocation2 + $0x28] sm:$0xff] %vm788_vm3, %v819_v43  ;;  %v1285_v43 = vld [vmem:[%s3837_s2 + $0x128] sm:$0xff] }
 0x299   : > { %v817_v44 = vpop.permute.xlu1 %816  ;;  %v829_v45 = vpop.permute.xlu0 %828 }
 0x29a   : > { %822 = vst.msk [vmem:[#allocation2 + $0x8] sm:$0xff] %vm788_vm3, %v817_v44 }
 0x29b   : > { %833 = vst.msk [vmem:[#allocation2 + $0x28] sm:$0xff] %vm799_vm4, %v829_v45  ;;  %v1135_v45 = vunpack.c.0.s8 %v1134_v35  ;;  %v1290_v35 = vld [vmem:[%s3837_s2 + $0x150] sm:$0xff] }
 0x29d   : > { %v827_v46 = vpop.permute.xlu0 %826 }
 0x29e   : > { %832 = vst.msk [vmem:[#allocation2 + $0x8] sm:$0xff] %vm799_vm4, %v827_v46  ;;  %v3367_v46 = vshrl.u32 %v1127_v33, 7 }
 0x2a1   : > { %v841_v47 = vpop.permute.xlu1 %840 }
 0x2a2   : > { %845 = vst.msk [vmem:[#allocation2 + $0x30] sm:$0xff] %vm777_vm2, %v841_v47  ;;  %v968_v52 = vld [vmem:[#allocation2 + $0x28] sm:$0xff]  ;;  %v2487_v47 = vpack.c.bf16 %v1333_v41, %v1332_v39  ;;  %v1322_v41 = vld [vmem:[%s3837_s2 + $0x250] sm:$0xff] }
 0x2a5   : > { %v839_v48 = vpop.permute.xlu1 %838  ;;  %v964_v49 = vld [vmem:[#allocation2 + $0x8] sm:$0xff] }
 0x2a6   : > { %844 = vst.msk [vmem:[#allocation2 + $0x10] sm:$0xff] %vm777_vm2, %v839_v48  ;;  %1039 = vmatprep.mubr.f32.mxu0 %v964_v49  ;;  %v849_v50 = vpop.permute.xlu0 %848  ;;  %v2457_v48 = vpack.c.bf16 %v1285_v43, %v1284_v42  ;;  %v1316_v49 = vld [vmem:[%s3837_s2 + $0x220] sm:$0xff]  ;;  %v1323_v42 = vld [vmem:[%s3837_s2 + $0x258] sm:$0xff] }
 0x2a7   : > { %854 = vst.msk [vmem:[#allocation2 + $0x10] sm:$0xff] %vm788_vm3, %v849_v50  ;;  %1040 = vmatmul.mubr.f32.vlgmr.msra.gmra.mrb[22].mxu0 %v963_v51  ;;  %v1317_v50 = vld [vmem:[%s3837_s2 + $0x228] sm:$0xff] }
 0x2a8   : > { %1044 = vmatprep.mubr.f32.mxu0 %v968_v52  ;;  %2450 = vmatpush3.bf16.msra.mxu0 %v2449_v11  ;;  %v2489_v52 = vpack.c.bf16 %v1317_v50, %v1316_v49  ;;  %v2463_v11 = vpack.c.bf16 %v1305_v8, %v1304_v7  ;;  %v1311_v7 = vld [vmem:[%s3837_s2 + $0x1f8] sm:$0xff]  ;;  %v1342_v8 = vld [vmem:[%s3837_s2 + $0x2f0] sm:$0xff] }
 0x2a9   : > { %2452 = vmatprep.subr.bf16.mxu0 %v2451_v19  ;;  %v2465_v19 = vpack.c.bf16 %v1289_v14, %v1288_v13  ;;  %v2507_v12 = vpack.c.bf16 %v1343_v9, %v1342_v8  ;;  %v1294_v13 = vld [vmem:[%s3837_s2 + $0x170] sm:$0xff]  ;;  %v1295_v14 = vld [vmem:[%s3837_s2 + $0x178] sm:$0xff]  ;;  %v1396_v8 = vld [vmem:[%s3837_s2 + $0x4a0] sm:$0xff] }
 0x2aa   : > { %v859_v53 = vpop.permute.xlu0 %858  ;;  %v1397_v9 = vld [vmem:[%s3837_s2 + $0x4a8] sm:$0xff] }
 0x2ab   : > { %864 = vst.msk [vmem:[#allocation2 + $0x10] sm:$0xff] %vm799_vm4, %v859_v53  ;;  %1045 = vmatmul.mubr.f32.gmra.mrb[24].mxu0 %v967_v54 }
 0x2ac   : > { %2454 = vmatpush3.bf16.msra.mxu0 %v2453_v24 }
 0x2ad   : > { %2456 = vmatprep.subr.bf16.mxu0 %v2455_v40 }
 0x2b0   : > { %2458 = vmatpush3.bf16.msra.mxu0 %v2457_v48 }
 0x2b1   : > { %v873_v55 = vpop.permute.xlu1 %872 }
 0x2b2   : > { %877 = vst.msk [vmem:[#allocation2 + $0x38] sm:$0xff] %vm777_vm2, %v873_v55  ;;  %v965_v0 = vld [vmem:[#allocation2 + $0x10] sm:$0xff] }
 0x2b3   : > { %v1302_v55 = vld [vmem:[%s3837_s2 + $0x1b0] sm:$0xff] }
 0x2b5   : > { %v871_v56 = vpop.permute.xlu1 %870 }
 0x2b6   : > { %876 = vst.msk [vmem:[#allocation2 + $0x18] sm:$0xff] %vm777_vm2, %v871_v56  ;;  %v881_v57 = vpop.permute.xlu0 %880  ;;  %v1303_v56 = vld [vmem:[%s3837_s2 + $0x1b8] sm:$0xff] }
 0x2b7   : > { %886 = vst.msk [vmem:[#allocation2 + $0x18] sm:$0xff] %vm788_vm3, %v881_v57  ;;  %v1334_v57 = vld [vmem:[%s3837_s2 + $0x2b0] sm:$0xff] }
 0x2ba   : > { %v883_v58 = vpop.permute.xlu0 %882  ;;  %v891_v59 = vpop.permute.xlu1 %890 }
 0x2bb   : > { %887 = vst.msk [vmem:[#allocation2 + $0x38] sm:$0xff] %vm788_vm3, %v883_v58  ;;  %v2459_v58 = vpack.c.bf16 %v1303_v56, %v1302_v55 }
 0x2bc   : > { %896 = vst.msk [vmem:[#allocation2 + $0x18] sm:$0xff] %vm799_vm4, %v891_v59  ;;  %v1335_v59 = vld [vmem:[%s3837_s2 + $0x2b8] sm:$0xff] }
 0x2bd   : > { %2460 = vmatprep.subr.bf16.mxu0 %v2459_v58  ;;  %v1292_v58 = vld [vmem:[%s3837_s2 + $0x160] sm:$0xff] }
 0x2be   : > { %v893_v60 = vpop.permute.xlu0 %892  ;;  %v851_v61 = vpop.permute.xlu1 %850 }
 0x2bf   : > { %897 = vst.msk [vmem:[#allocation2 + $0x38] sm:$0xff] %vm799_vm4, %v893_v60  ;;  %v1286_v60 = vld [vmem:[%s3837_s2 + $0x130] sm:$0xff] }
 0x2c0   : > { %855 = vst.msk [vmem:[#allocation2 + $0x30] sm:$0xff] %vm788_vm3, %v851_v61  ;;  %v1287_v61 = vld [vmem:[%s3837_s2 + $0x138] sm:$0xff] }
 0x2c2   : > { %v861_v62 = vpop.permute.xlu1 %860 }
 0x2c3   : > { %v966_v63 = vld [vmem:[#allocation2 + $0x18] sm:$0xff]  ;;  %865 = vst.msk [vmem:[#allocation2 + $0x30] sm:$0xff] %vm799_vm4, %v861_v62 }
 0x2c4   : > { %1114 = vmatprep.mubr.f32.mxu1 %v966_v63  ;;  %v3394_v63 = vsub.s32 %v1135_v45, %v3367_v46 }
 0x2c5   : > { %1115 = vmatmul.mubr.f32.vlgmr.msra.gmra.mrb[32].mxu1 %v965_v0  ;;  %v2491_v0 = vpack.c.bf16 %v1335_v59, %v1334_v57  ;;  %v1341_v57 = vld [vmem:[%s3837_s2 + $0x2e8] sm:$0xff] }
 0x2c6   : > { %v970_v1 = vld [vmem:[#allocation2 + $0x38] sm:$0xff]  ;;  %2482 = vmatpush3.bf16.msra.mxu1 %v2481_v15  ;;  %v1293_v59 = vld [vmem:[%s3837_s2 + $0x168] sm:$0xff] }
 0x2c7   : > { %1119 = vmatprep.mubr.f32.mxu1 %v970_v1  ;;  %2484 = vmatprep.subr.bf16.mxu1 %v2483_v20  ;;  %v2461_v1 = vpack.c.bf16 %v1287_v61, %v1286_v60  ;;  %v1320_v20 = vld [vmem:[%s3837_s2 + $0x240] sm:$0xff]  ;;  %v2473_v61 = vpack.c.bf16 %v1293_v59, %v1292_v58 }
 0x2c8   : > { %v2497_v24 = vpack.c.bf16 %v1321_v21, %v1320_v20  ;;  %v1327_v20 = vld [vmem:[%s3837_s2 + $0x278] sm:$0xff]  ;;  %v2477_v21 = vpack.c.bf16 %v1295_v14, %v1294_v13  ;;  %v1348_v14 = vld [vmem:[%s3837_s2 + $0x320] sm:$0xff] }
 0x2c9   : > { %2462 = vmatpush3.bf16.msra.mxu0 %v2461_v1  ;;  %v1310_v1 = vld [vmem:[%s3837_s2 + $0x1f0] sm:$0xff] }
 0x2ca   : > { %v969_v2 = vld [vmem:[#allocation2 + $0x30] sm:$0xff]  ;;  %2486 = vmatpush3.bf16.msra.mxu1 %v2485_v26  ;;  %2464 = vmatprep.subr.bf16.mxu0 %v2463_v11  ;;  %v2475_v11 = vpack.c.bf16 %v1311_v7, %v1310_v1  ;;  %v1365_v7 = vld [vmem:[%s3837_s2 + $0x3a8] sm:$0xff] }
 0x2cb   : > { %1120 = vmatmul.mubr.f32.gmra.mrb[34].mxu1 %v969_v2  ;;  %2488 = vmatprep.subr.bf16.mxu1 %v2487_v47  ;;  %v1318_v2 = vld [vmem:[%s3837_s2 + $0x230] sm:$0xff]  ;;  %v2501_v47 = vpack.c.bf16 %v1323_v42, %v1322_v41  ;;  %v1344_v41 = vld [vmem:[%s3837_s2 + $0x300] sm:$0xff]  ;;  %v1424_v42 = vsub.s32 3, %v3367_v46 }
 0x2cc   : > { %v2493_v5 = vpack.c.bf16 %v1319_v3, %v1318_v2  ;;  %v1378_v1 = vld [vmem:[%s3837_s2 + $0x410] sm:$0xff] }
 0x2cd   : > { %2466 = vmatpush3.bf16.msra.mxu0 %v2465_v19 }
 0x2ce   : > { %2490 = vmatpush3.bf16.msra.mxu1 %v2489_v52  ;;  %v1309_v52 = vld [vmem:[%s3837_s2 + $0x1e8] sm:$0xff] }
 0x2cf   : > { %2492 = vmatprep.subr.bf16.mxu1 %v2491_v0  ;;  %v1325_v0 = vld [vmem:[%s3837_s2 + $0x268] sm:$0xff] }
 0x2d2   : > { %2494 = vmatpush3.bf16.msra.mxu1 %v2493_v5 }
 0x2d3   : > { %2496 = vmatprep.subr.bf16.mxu1 %v2495_v18 }
 0x2d6   : > { %2498 = vmatpush3.bf16.msra.mxu1 %v2497_v24 }
 0x37a   : > { %v2061_v27 = vpop.f32.mrb[22].mxu0 }
 0x37b   : > { %v2062_v28 = vpop.f32.mrb[23].mxu0 }
 0x37c   : > { %v2063_v29 = vadd.f32 %v2062_v28, %v2061_v27  ;;  %v1306_v28 = vld [vmem:[%s3837_s2 + $0x1d0] sm:$0xff] }
 0x37e   : > { %v2064_v30 = vpop.f32.mrb[24].mxu0  ;;  %v1042_v53 = vadd.f32 %v2063_v29, %v1916_v36  ;;  %v1307_v29 = vld [vmem:[%s3837_s2 + $0x1d8] sm:$0xff] }
 0x37f   : > { %v2065_v31 = vpop.f32.mrb[25].mxu0 }
 0x380   : > { %v3343_v32 = vadd.f32 %v2065_v31, %v2064_v30  ;;  %v1338_v30 = vld [vmem:[%s3837_s2 + $0x2d0] sm:$0xff] }
 0x382   : > { %v1047_v22 = vadd.f32 %v3343_v32, %v1916_v36  ;;  %v2467_v32 = vpack.c.bf16 %v1307_v29, %v1306_v28  ;;  %v1291_v36 = vld [vmem:[%s3837_s2 + $0x158] sm:$0xff]  ;;  %v1392_v28 = vld [vmem:[%s3837_s2 + $0x480] sm:$0xff] }
 0x383   : > { %v2469_v45 = vpack.c.bf16 %v1291_v36, %v1290_v35 }
 0x384   : > { %2468 = vmatprep.subr.bf16.mxu0 %v2467_v32 }
 0x385   : > { %2470 = vmatpush3.bf16.msra.mxu0 %v2469_v45  ;;  %v1345_v45 = vld [vmem:[%s3837_s2 + $0x308] sm:$0xff] }
 0x398   : > { %v2099_v44 = vpop.f32.mrb[32].mxu1 }
 0x399   : > { %v2100_v51 = vpop.f32.mrb[33].mxu1 }
 0x39a   : > { %v2101_v54 = vadd.f32 %v2100_v51, %v2099_v44  ;;  %v2499_v44 = vpack.c.bf16 %v1339_v34, %v1338_v30  ;;  %v1308_v51 = vld [vmem:[%s3837_s2 + $0x1e0] sm:$0xff] }
 0x39b   : > { %v2471_v56 = vpack.c.bf16 %v1309_v52, %v1308_v51  ;;  %v2513_v52 = vpack.c.bf16 %v1345_v45, %v1344_v41  ;;  %v1385_v41 = vld [vmem:[%s3837_s2 + $0x448] sm:$0xff]  ;;  %v1403_v45 = vld [vmem:[%s3837_s2 + $0x4d8] sm:$0xff] }
 0x39c   : > { %v1117_v62 = vadd.f32 %v2101_v54, %v1042_v53  ;;  %v1340_v53 = vld [vmem:[%s3837_s2 + $0x2e0] sm:$0xff]  ;;  %2500 = vmatprep.subr.bf16.mxu1 %v2499_v44  ;;  %v1420_v44 = vsub.s32 2, %v3367_v46 }
 0x39d   : > { %2502 = vmatpush3.bf16.msra.mxu1 %v2501_v47  ;;  %v2503_v60 = vpack.c.bf16 %v1341_v57, %v1340_v53  ;;  %2472 = vmatprep.subr.bf16.mxu0 %v2471_v56  ;;  %v1376_v47 = vld [vmem:[%s3837_s2 + $0x400] sm:$0xff]  ;;  %v1394_v56 = vld [vmem:[%s3837_s2 + $0x490] sm:$0xff]  ;;  %v1395_v57 = vld [vmem:[%s3837_s2 + $0x498] sm:$0xff] }
 0x39e   : > { %v1125_v6 = vmax.f32 %v1117_v62, 0.0  ;;  %v2102_v10 = vpop.f32.mrb[34].mxu1  ;;  %v1324_v62 = vld [vmem:[%s3837_s2 + $0x260] sm:$0xff]  ;;  %2474 = vmatpush3.bf16.msra.mxu0 %v2473_v61 }
 0x39f   : > { %v2103_v17 = vpop.f32.mrb[35].mxu1  ;;  %2504 = vmatprep.subr.bf16.mxu1 %v2503_v60  ;;  %2476 = vmatprep.subr.bf16.mxu0 %v2475_v11 }
 0x3a0   : > { %v1139_v15 = vrot.slane %v1125_v6, %v3394_v63  ;;  %v1170_v16 = vcombine.high %v1125_v6, %v1125_v6  ;;  %1131 = vst.msk [vmem:[#allocation3] sm:$0x1] %vm3403_vm5, %v1125_v6  ;;  %v2104_v23 = vadd.f32 %v2103_v17, %v2102_v10  ;;  %v2505_v6 = vpack.c.bf16 %v1325_v0, %v1324_v62  ;;  %v1346_v62 = vld [vmem:[%s3837_s2 + $0x310] sm:$0xff]  ;;  %v1347_v0 = vld [vmem:[%s3837_s2 + $0x318] sm:$0xff] }
 0x3a2   : > { %v1140_v25 = vcombine.high %v1139_v15, %v1139_v15  ;;  %v1177_v26 = vrot.slane %v1170_v16, %v3394_v63  ;;  %v1147_v27 = vrot.slane %v1139_v15, %v3394_v63  ;;  %v1122_v31 = vadd.f32 %v2104_v23, %v1047_v22  ;;  %v1326_v15 = vld [vmem:[%s3837_s2 + $0x270] sm:$0xff]  ;;  %2506 = vmatpush3.bf16.msra.mxu1 %v2505_v6 }
 0x3a3   : > { %v2509_v22 = vpack.c.bf16 %v1327_v20, %v1326_v15  ;;  %2508 = vmatprep.subr.bf16.mxu1 %v2507_v12  ;;  %2478 = vmatpush3.bf16.msra.mxu0 %v2477_v21  ;;  %v2547_v6 = vpack.c.bf16 %v1395_v57, %v1394_v56  ;;  %v2517_v12 = vpack.c.bf16 %v1347_v0, %v1346_v62  ;;  %v1349_v15 = vld [vmem:[%s3837_s2 + $0x328] sm:$0xff]  ;;  %v1366_v20 = vld [vmem:[%s3837_s2 + $0x3b0] sm:$0xff]  ;;  %v1367_v21 = vld [vmem:[%s3837_s2 + $0x3b8] sm:$0xff] }
 0x3a4   : > { %v1154_v37 = vrot.slane %v1140_v25, %v3394_v63  ;;  %v1187_v38 = vcombine.high %v1177_v26, %v1177_v26  ;;  %v1162_v39 = vcombine.high %v1147_v27, %v1147_v27  ;;  %v1184_v40 = vrot.slane %v1177_v26, %v3394_v63  ;;  %v1360_v26 = vld [vmem:[%s3837_s2 + $0x380] sm:$0xff]  ;;  %v1361_v27 = vld [vmem:[%s3837_s2 + $0x388] sm:$0xff] }
 0x3a5   : > { %v1126_v43 = vmax.f32 %v1122_v31, 0.0  ;;  %v2511_v29 = vpack.c.bf16 %v1361_v27, %v1360_v26  ;;  %v1350_v26 = vld [vmem:[%s3837_s2 + $0x330] sm:$0xff]  ;;  %v1351_v27 = vld [vmem:[%s3837_s2 + $0x338] sm:$0xff]  ;;  %v1372_v56 = vld [vmem:[%s3837_s2 + $0x3e0] sm:$0xff] }
 0x3a6   : > { %1155 = vrot.lane.b32.xlu0 %v1154_v37, %s2693_s15  ;;  %v1165_v48 = vcombine.high %v1154_v37, %v1154_v37  ;;  %v1194_v49 = vrot.slane %v1187_v38, %v3394_v63  ;;  %1164 = vst.msk [vmem:[#allocation3 + $0x1] sm:$0x1] %vm3403_vm5, %v1162_v39  ;;  %1186 = vst.msk [vmem:[#allocation3 + $0x2] sm:$0x1] %vm3403_vm5, %v1184_v40  ;;  %v1199_v50 = vcombine.high %v1184_v40, %v1184_v40  ;;  %v1373_v57 = vld [vmem:[%s3837_s2 + $0x3e8] sm:$0xff]  ;;  %v1356_v62 = vld [vmem:[%s3837_s2 + $0x360] sm:$0xff] }
 0x3a7   : > { %v1215_v54 = vrot.slane %v1126_v43, %v3394_v63  ;;  %v1243_v55 = vcombine.high %v1126_v43, %v1126_v43  ;;  %1207 = vst.msk [vmem:[#allocation3 + $0x4] sm:$0x1] %vm3403_vm5, %v1126_v43  ;;  %2510 = vmatpush3.bf16.msra.mxu1 %v2509_v22  ;;  %2512 = vmatprep.subr.bf16.mxu0 %v2511_v29  ;;  %v1416_v40 = vsub.s32 1, %v3367_v46  ;;  %v1412_v43 = vsub.s32 0, %v3367_v46  ;;  %v1398_v22 = vld [vmem:[%s3837_s2 + $0x4b0] sm:$0xff]  ;;  %v1357_v0 = vld [vmem:[%s3837_s2 + $0x368] sm:$0xff] }
 0x3a8   : > { %1166 = vrot.lane.b32.xlu1 %v1165_v48, %s2693_s15  ;;  %1201 = vst.msk [vmem:[#allocation3 + $0x3] sm:$0x1] %vm3403_vm5, %v1199_v50  ;;  %v1202_v10 = vcombine.high %v1194_v49, %v1194_v49  ;;  %v1377_v48 = vld [vmem:[%s3837_s2 + $0x408] sm:$0xff]  ;;  %v1363_v50 = vld [vmem:[%s3837_s2 + $0x398] sm:$0xff] }
 0x3a9   : > { %v1216_v2 = vcombine.high %v1215_v54, %v1215_v54  ;;  %v1250_v3 = vrot.slane %v1243_v55, %v3394_v63  ;;  %v1223_v5 = vrot.slane %v1215_v54, %v3394_v63  ;;  %v2545_v53 = vpack.c.bf16 %v1377_v48, %v1376_v47 }
 0x3aa   : > { %1195 = vrot.lane.b32.xlu0 %v1194_v49, %s2693_s15  ;;  %v1362_v49 = vld [vmem:[%s3837_s2 + $0x390] sm:$0xff]  ;;  %v1432_v54 = vsub.s32 5, %v3367_v46  ;;  %v1440_v55 = vsub.s32 7, %v3367_v46 }
 0x3ab   : > { %v1230_v16 = vrot.slane %v1216_v2, %v3394_v63  ;;  %v1260_v17 = vcombine.high %v1250_v3, %v1250_v3  ;;  %v1235_v18 = vcombine.high %v1223_v5, %v1223_v5  ;;  %v1257_v19 = vrot.slane %v1250_v3, %v3394_v63  ;;  %v1379_v2 = vld [vmem:[%s3837_s2 + $0x418] sm:$0xff]  ;;  %v1364_v3 = vld [vmem:[%s3837_s2 + $0x3a0] sm:$0xff] }
 0x3ac   : > { %1203 = vrot.lane.b32.xlu1 %v1202_v10, %s2693_s15  ;;  %v2515_v5 = vpack.c.bf16 %v1363_v50, %v1362_v49  ;;  %v2549_v13 = vpack.c.bf16 %v1379_v2, %v1378_v1  ;;  %v1354_v49 = vld [vmem:[%s3837_s2 + $0x350] sm:$0xff]  ;;  %v1355_v50 = vld [vmem:[%s3837_s2 + $0x358] sm:$0xff]  ;;  %v2535_v1 = vpack.c.bf16 %v1373_v57, %v1372_v56 }
 0x3ad   : > { %v1238_v23 = vcombine.high %v1230_v16, %v1230_v16  ;;  %1237 = vst.msk [vmem:[#allocation3 + $0x5] sm:$0x1] %vm3403_vm5, %v1235_v18  ;;  %1259 = vst.msk [vmem:[#allocation3 + $0x6] sm:$0x1] %vm3403_vm5, %v1257_v19  ;;  %v1272_v24 = vcombine.high %v1257_v19, %v1257_v19  ;;  %v1267_v25 = vrot.slane %v1260_v17, %v3394_v63  ;;  %v1393_v63 = vld [vmem:[%s3837_s2 + $0x488] sm:$0xff]  ;;  %v1380_v18 = vld [vmem:[%s3837_s2 + $0x420] sm:$0xff] }
 0x3ae   : > { %1231 = vrot.lane.b32.xlu0 %v1230_v16, %s2693_s15  ;;  %v2543_v30 = vpack.c.bf16 %v1393_v63, %v1392_v28  ;;  %v2519_v16 = vpack.c.bf16 %v1365_v7, %v1364_v3  ;;  %v2551_v17 = vpack.c.bf16 %v1397_v9, %v1396_v8  ;;  %v1381_v19 = vld [vmem:[%s3837_s2 + $0x428] sm:$0xff]  ;;  %v2523_v28 = vpack.c.bf16 %v1367_v21, %v1366_v20  ;;  %v1382_v63 = vld [vmem:[%s3837_s2 + $0x430] sm:$0xff]  ;;  %v1388_v3 = vld [vmem:[%s3837_s2 + $0x460] sm:$0xff] }
 0x3af   : > { %1274 = vst.msk [vmem:[#allocation3 + $0x7] sm:$0x1] %vm3403_vm5, %v1272_v24  ;;  %v1275_v31 = vcombine.high %v1267_v25, %v1267_v25  ;;  %v2521_v24 = vpack.c.bf16 %v1349_v15, %v1348_v14  ;;  %v1375_v7 = vld [vmem:[%s3837_s2 + $0x3f8] sm:$0xff]  ;;  %v1406_v8 = vld [vmem:[%s3837_s2 + $0x4f0] sm:$0xff]  ;;  %v1428_v20 = vsub.s32 4, %v3367_v46  ;;  %v1436_v21 = vsub.s32 6, %v3367_v46 }
 0x3b0   : > { %1239 = vrot.lane.b32.xlu1 %v1238_v23, %s2693_s15  ;;  %2544 = vmatprep.subr.bf16.mxu1 %v2543_v30  ;;  %v1399_v23 = vld [vmem:[%s3837_s2 + $0x4b8] sm:$0xff]  ;;  %v1732_v46 = vld [vmem:[%s3839_s4 + $0x10] sm:$0xff] }
 0x3b1   : > { %v2555_v29 = vpack.c.bf16 %v1399_v23, %v1398_v22  ;;  %v1383_v30 = vld [vmem:[%s3837_s2 + $0x438] sm:$0xff] }
 0x3b2   : > { %1268 = vrot.lane.b32.xlu0 %v1267_v25, %s2693_s15  ;;  %v2553_v25 = vpack.c.bf16 %v1381_v19, %v1380_v18  ;;  %v1407_v9 = vld [vmem:[%s3837_s2 + $0x4f8] sm:$0xff] }
 0x3b3   : > { %v2571_v14 = vpack.c.bf16 %v1407_v9, %v1406_v8  ;;  %v1359_v15 = vld [vmem:[%s3837_s2 + $0x378] sm:$0xff] }
 0x3b4   : > { %1276 = vrot.lane.b32.xlu1 %v1275_v31, %s2693_s15  ;;  %v1368_v31 = vld [vmem:[%s3837_s2 + $0x3c0] sm:$0xff]  ;;  %s215_s15 = sand.u32 1, %s2682_s19  }
 0x3b5   : > { %s216_s7 = scalar_lea.vmem [#allocation4], %s215_s15  ;;  %s1811_s13 = scalar_lea.sflag [#allocation5], %s215_s15 }
 0x3b6   : > { %s1823_s8 = sshll.u32 %s216_s7, 4  ;;  %s3795_s8 = int_to_ptr.vmem [resolvable:$true] %s1823_s8 }
 0x3b7   : > { %s2628_s10 = scalar_lea.vmem %s3795_s8, 16  ;;  %p2635_p0 = scmp.lt.s32.totalorder %s3795_s8, %s2633_s14 }
 0x3b8   : > { %p2629_p11 = scmp.ne.s32.totalorder %s3795_s8, %s2628_s10  ;;  %p2636_p1 = scmp.lt.s32.totalorder %s2634_s30, %s2628_s10 }
 0x3ba   : > { %p2630_p12 = pnand %p2629_p11, %p2768_p5  ;;  %p2637_p2 = por %p2636_p1, %p2635_p0 }
 0x3bc   : > { %p2631_p13 = pneg %p2630_p12 }
 0x3be   : > { %p2638_p3 = pnand %p2637_p2, %p2631_p13 }
 0x418   : > { %v1156_v32 = vpop.permute.xlu0 %1155 }
 0x419   : > { %1161 = vst.msk [vmem:[#allocation3] sm:$0x1] %vm3554_vm8, %v1156_v32  ;;  %v1400_v32 = vld [vmem:[%s3837_s2 + $0x4c0] sm:$0xff] }
 0x41a   : > { %v1167_v34 = vpop.permute.xlu1 %1166 }
 0x41b   : > { %1169 = vst.msk [vmem:[#allocation3 + $0x1] sm:$0x1] %vm3554_vm8, %v1167_v34  ;;  %v1401_v34 = vld [vmem:[%s3837_s2 + $0x4c8] sm:$0xff] }
 0x41c   : > { %v1196_v35 = vpop.permute.xlu0 %1195 }
 0x41d   : > { %1198 = vst.msk [vmem:[#allocation3 + $0x2] sm:$0x1] %vm3554_vm8, %v1196_v35  ;;  %v2525_v35 = vpack.c.bf16 %v1351_v27, %v1350_v26  ;;  %v2696_v27 = vmov 0.0|0.0  }
 0x41e   : > { %v1204_v36 = vpop.permute.xlu1 %1203 }
 0x41f   : > { %1206 = vst.msk [vmem:[#allocation3 + $0x3] sm:$0x1] %vm3554_vm8, %v1204_v36  ;;  %v2557_v36 = vpack.c.bf16 %v1383_v30, %v1382_v63 }
 0x420   : > { %v1232_v33 = vpop.permute.xlu0 %1231 }
 0x421   : > { %1234 = vst.msk [vmem:[#allocation3 + $0x4] sm:$0x1] %vm3554_vm8, %v1232_v33  ;;  %v1352_v33 = vld [vmem:[%s3837_s2 + $0x340] sm:$0xff] }
 0x422   : > { %v1240_v37 = vpop.permute.xlu1 %1239 }
 0x423   : > { %1242 = vst.msk [vmem:[#allocation3 + $0x5] sm:$0x1] %vm3554_vm8, %v1240_v37  ;;  %v1353_v37 = vld [vmem:[%s3837_s2 + $0x348] sm:$0xff] }
 0x424   : > { %v1269_v38 = vpop.permute.xlu0 %1268  ;;  %v2529_v47 = vpack.c.bf16 %v1353_v37, %v1352_v33 }
 0x425   : > { %1271 = vst.msk [vmem:[#allocation3 + $0x6] sm:$0x1] %vm3554_vm8, %v1269_v38  ;;  %v2527_v38 = vpack.c.bf16 %v1369_v4, %v1368_v31 }
 0x426   : > { %v1277_v39 = vpop.permute.xlu1 %1276 }
 0x427   : > { %1279 = vst.msk [vmem:[#allocation3 + $0x7] sm:$0x1] %vm3554_vm8, %v1277_v39  ;;  %v2559_v39 = vpack.c.bf16 %v1401_v34, %v1400_v32 }
 0x42e   : > { %v3596_v51 = vld [vmem:[#allocation3] sm:$0xff] }
 0x42f   : > { %v1417_v58 = vrot.slane %v3596_v51, %v1416_v40  ;;  %v1425_v59 = vrot.slane %v3596_v51, %v1424_v42  ;;  %v1413_v60 = vrot.slane %v3596_v51, %v1412_v43  ;;  %v1421_v61 = vrot.slane %v3596_v51, %v1420_v44  ;;  %v1384_v40 = vld [vmem:[%s3837_s2 + $0x440] sm:$0xff]  ;;  %v1370_v42 = vld [vmem:[%s3837_s2 + $0x3d0] sm:$0xff]  ;;  %v1371_v43 = vld [vmem:[%s3837_s2 + $0x3d8] sm:$0xff] }
 0x430   : > { %v1433_v10 = vrot.slane %v3596_v51, %v1432_v54  ;;  %v1441_v11 = vrot.slane %v3596_v51, %v1440_v55  ;;  %v1402_v44 = vld [vmem:[%s3837_s2 + $0x4d0] sm:$0xff]  ;;  %v2561_v48 = vpack.c.bf16 %v1385_v41, %v1384_v40  ;;  %v1387_v55 = vld [vmem:[%s3837_s2 + $0x458] sm:$0xff]  ;;  %v1429_v22 = vrot.slane %v3596_v51, %v1428_v20 }
 0x431   : > { %1514 = vmatprep.mubr.f32.mxu0 %v1417_v58  ;;  %1584 = vmatprep.mubr.f32.mxu1 %v1425_v59  ;;  %v1386_v54 = vld [vmem:[%s3837_s2 + $0x450] sm:$0xff]  ;;  %v1404_v58 = vld [vmem:[%s3837_s2 + $0x4e0] sm:$0xff]  ;;  %v1405_v59 = vld [vmem:[%s3837_s2 + $0x4e8] sm:$0xff]  ;;  %v1437_v23 = vrot.slane %v3596_v51, %v1436_v21 }
 0x432   : > { %1515 = vmatmul.mubr.f32.vlgmr.msra.gmra.mrb[26].mxu0 %v1413_v60  ;;  %1585 = vmatmul.mubr.f32.vlgmr.msra.gmra.mrb[36].mxu1 %v1421_v61  ;;  %v2533_v60 = vpack.c.bf16 %v1355_v50, %v1354_v49  ;;  %v2565_v61 = vpack.c.bf16 %v1387_v55, %v1386_v54  ;;  %v2567_v2 = vpack.c.bf16 %v1405_v59, %v1404_v58  ;;  %v1733_v51 = vld [vmem:[%s3839_s4 + $0x18] sm:$0xff] }
 0x433   : > { %2514 = vmatpush3.bf16.msra.mxu0 %v2513_v52  ;;  %2546 = vmatpush3.bf16.msra.mxu1 %v2545_v53  ;;  %v2531_v52 = vpack.c.bf16 %v1371_v43, %v1370_v42  ;;  %v2563_v53 = vpack.c.bf16 %v1403_v45, %v1402_v44  ;;  %v1734_v43 = vld [vmem:[%s3839_s4 + $0x20] sm:$0x1] }
 0x434   : > { %1654 = vmatprep.mubr.f32.mxu0 %v1433_v10  ;;  %1724 = vmatprep.mubr.f32.mxu1 %v1441_v11  ;;  %v2537_v10 = vpack.c.bf16 %v1357_v0, %v1356_v62 }
 0x435   : > { %2516 = vmatprep.subr.bf16.mxu0 %v2515_v5  ;;  %2548 = vmatprep.subr.bf16.mxu1 %v2547_v6  ;;  %v1389_v5 = vld [vmem:[%s3837_s2 + $0x468] sm:$0xff]  ;;  %v1374_v6 = vld [vmem:[%s3837_s2 + $0x3f0] sm:$0xff] }
 0x436   : > { %v2569_v11 = vpack.c.bf16 %v1389_v5, %v1388_v3 }
 0x437   : > { %2518 = vmatpush3.bf16.msra.mxu0 %v2517_v12  ;;  %2550 = vmatpush3.bf16.msra.mxu1 %v2549_v13  ;;  %v1358_v12 = vld [vmem:[%s3837_s2 + $0x370] sm:$0xff]  ;;  %v2539_v13 = vpack.c.bf16 %v1375_v7, %v1374_v6 }
 0x438   : > { %2520 = vmatprep.subr.bf16.mxu0 %v2519_v16  ;;  %2552 = vmatprep.subr.bf16.mxu1 %v2551_v17  ;;  %v1390_v16 = vld [vmem:[%s3837_s2 + $0x470] sm:$0xff]  ;;  %v1391_v17 = vld [vmem:[%s3837_s2 + $0x478] sm:$0xff]  ;;  %v2541_v18 = vpack.c.bf16 %v1359_v15, %v1358_v12 }
 0x439   : > { %v2573_v19 = vpack.c.bf16 %v1391_v17, %v1390_v16 }
 0x43b   : > { %2522 = vmatpush3.bf16.msra.mxu0 %v2521_v24  ;;  %2554 = vmatpush3.bf16.msra.mxu1 %v2553_v25  ;;  %v1730_v24 = vld [vmem:[%s3839_s4] sm:$0xff]  ;;  %v1731_v25 = vld [vmem:[%s3839_s4 + $0x8] sm:$0xff] }
 0x43c   : > { %2524 = vmatprep.subr.bf16.mxu0 %v2523_v28  ;;  %2556 = vmatprep.subr.bf16.mxu1 %v2555_v29  ;;  %v2576_v26 = vpack.c.bf16 %v1731_v25, %v1730_v24  ;;  %v2579_v28 = vpack.c.bf16 %v1733_v51, %v1732_v46  ;;  %v2698_v29 = vmov 0.0  }
 0x43f   : > { %2526 = vmatpush3.bf16.msra.mxu0 %v2525_v35  ;;  %2558 = vmatpush3.bf16.msra.mxu1 %v2557_v36 }
 0x440   : > { %2528 = vmatprep.subr.bf16.mxu0 %v2527_v38  ;;  %2560 = vmatprep.subr.bf16.mxu1 %v2559_v39 }
 0x443   : > { %2530 = vmatpush3.bf16.msra.mxu0 %v2529_v47  ;;  %2562 = vmatpush3.bf16.msra.mxu1 %v2561_v48 }
 0x444   : > { %2532 = vmatprep.subr.bf16.mxu0 %v2531_v52  ;;  %2564 = vmatprep.subr.bf16.mxu1 %v2563_v53 }
 0x447   : > { %2534 = vmatpush3.bf16.msra.mxu0 %v2533_v60  ;;  %2566 = vmatpush3.bf16.msra.mxu1 %v2565_v61 }
 0x448   : > { %2536 = vmatprep.subr.bf16.mxu0 %v2535_v1  ;;  %2568 = vmatprep.subr.bf16.mxu1 %v2567_v2 }
 0x44b   : > { %2538 = vmatpush3.bf16.msra.mxu0 %v2537_v10  ;;  %2570 = vmatpush3.bf16.msra.mxu1 %v2569_v11 }
 0x44c   : > { %2540 = vmatprep.subr.bf16.mxu0 %v2539_v13  ;;  %2572 = vmatprep.subr.bf16.mxu1 %v2571_v14 }
 0x44f   : > { %2542 = vmatpush3.bf16.msra.mxu0 %v2541_v18  ;;  %2574 = vmatpush3.bf16.msra.mxu1 %v2573_v19 }
 0x450   : > { %2575 = vmatprep.subr.bf16.mxu0 %v2696_v27 }
 0x452   : > { %1655 = vmatmul.mubr.f32.vlgmr.msra.gmra.mrb[28].mxu0 %v1429_v22  ;;  %1725 = vmatmul.mubr.f32.vlgmr.msra.gmra.mrb[38].mxu1 %v1437_v23 }
 0x453   : > { %2577 = vmatpush3.bf16.msra.mxu0 %v2576_v26  ;;  %2328 = vmatprep.mubr.msk.f32.mxu0 %vm2697_vm9, %v2698_v29 }
 0x454   : > { %2578 = vmatprep.subr.bf16.mxu0 %v2696_v27 }
 0x457   : > { %2580 = vmatpush3.bf16.msra.mxu0 %v2579_v28 }
 0x505   : > { %v2137_v63 = vpop.f32.mrb[26].mxu0  ;;  %v2172_v30 = vpop.f32.mrb[36].mxu1 }
 0x506   : > { %v2138_v31 = vpop.f32.mrb[27].mxu0  ;;  %v2173_v4 = vpop.f32.mrb[37].mxu1 }
 0x507   : > { %v2139_v32 = vadd.f32 %v2138_v31, %v2137_v63  ;;  %v2174_v34 = vadd.f32 %v2173_v4, %v2172_v30 }
 0x509   : > { %v1587_v35 = vadd.f32 %v2174_v34, %v2139_v32 }
 0x525   : > { %v2207_v36 = vpop.f32.mrb[28].mxu0  ;;  %v2242_v33 = vpop.f32.mrb[38].mxu1 }
 0x526   : > { %v2208_v37 = vpop.f32.mrb[29].mxu0  ;;  %v2243_v38 = vpop.f32.mrb[39].mxu1 }
 0x527   : > { %v2209_v39 = vadd.f32 %v2208_v37, %v2207_v36  ;;  %v2244_v40 = vadd.f32 %v2243_v38, %v2242_v33 }
 0x529   : > { %v1657_v41 = vadd.f32 %v2209_v39, %v1587_v35 }
 0x52b   : > { %v1727_v42 = vadd.f32 %v2244_v40, %v1657_v41 }
 0x52d   : > { %2329 = vmatmul.mubr.msk.f32.vlgmr.msra.gmra.mrb[30].mxu0 %vm766_vm1, %v1727_v42 }
 0x600   : > { %v1804_v44 = vpop.f32.mrb[30].mxu0 }
 0x601   : > { %v1805_v45 = vadd.f32 %v1804_v44, %v1734_v43  ;;  %v2330_v47 = vpop.f32.mrb[31].mxu0 }
 0x603   : > { %v1808_v48 = vmax.f32 %v1805_v45, 0.0 }
 0x605   : > { %1809 = vst [vmem:[%s216_s7] sm:$0x1] %v1808_v48 }
 0x606   : > { %2641 = shalt.err (!%p2638_p3)
}
 0x607   : > { %s2642_s6 = scalar_lea.hbm %s3793_s12, 16  ;;  %s2646_s15 = scalar_lea.hbm %s3840_s5, 32 }
 0x608   : > { %p2643_p4 = scmp.ne.s32.totalorder %s3793_s12, %s2642_s6  ;;  %p2647_p9 = scmp.lt.u32.totalorder %s3793_s12, %s3840_s5 }
 0x609   : > { %p2648_p10 = scmp.lt.u32.totalorder %s2646_s15, %s2642_s6  ;;  %p2650_p12 = scmp.lt.u32.totalorder %s2642_s6, %s3793_s12 }
 0x60a   : > { %p2644_p7 = pnand %p2643_p4, %p2768_p5 }
 0x60b   : > { %p2649_p11 = por %p2648_p10, %p2647_p9 }
 0x60c   : > { %p2645_p8 = pneg %p2644_p7 }
 0x60d   : > { %p2651_p13 = por %p2650_p12, %p2649_p11 }
 0x60f   : > { %p2652_p0 = pnand %p2651_p13, %p2645_p8 }
 0x611   : > { %2655 = shalt.err (!%p2652_p0)
}
 0x612   : > { %2582 = dma.vmem_to_hbm [thread:$0]  (%p2768_p5), %s3795_s8, 16, %s3793_s12, %s1811_s13  }
 0x613 PF: > { %p2588_p1 = scmp.ge.s32.totalorder %s2690_s21, 2  ;;  %s1835_s26 = sand.u32 1, %s2678_s18  }
 0x614   : > { %s1836_s7 = scalar_lea.sflag [#allocation5], %s1835_s26 }
 0x615   : > { %p2585_p2 = pnand %p2588_p1, %p2772_p6 }
 0x617   : > { %2673 = dma.done.wait (!%p2585_p2), %s1836_s7, 16  }
 0x618   : > { %2675 = vsyncadd (!%p2585_p2), %s1836_s7, 4294967280  ;;  %p15_p3 = scmp.ge.s32.totalorder %s2755_s24, 4   ;;  %s3847_s18 = smov %s2682_s19 }
 0x619   : > { %s3848_s19 = smov %s2686_s20  ;;  %s3849_s20 = smov %s2766_s27 }
 0x61a   : > { %s3850_s21 = smov %s2755_s24  ;;  %17 = sbr.rel (!%p15_p3) target bundleno = 3 (0x3), region = 75 }
 0x621   :  { %1840 = vsyncpa [#allocation5], 1 }
 0x622   :  { %1842 = vsyncpa [#allocation5 + $0x1], 1 }

</bundles_post_ra>
